<compile_context>
chip_gen: v5e
topology: v5e:2x2
jax: 0.10.0
libtpu: 0.0.40
codegen_flags: <defaults>
</compile_context>

<pallas_src>
import functools

import jax
import jax.numpy as jnp
from jax.experimental import pallas as pl
from jax.experimental.pallas import tpu as pltpu

EPS = 1e-5                                   # nn.BatchNorm2d default eps
SUBPOS = ((0, 0), (0, 1), (1, 0), (1, 1))    # output sub-positions (di, dj) of the 2x upsample


def _pack_2x2(xv, TH, W):
    """(TH+2, W+2, Cin) halo tile -> (TH+1, W+1, 4*Cin), channel order (rh, rw, ci)."""
    return jnp.concatenate(
        [xv[0:TH + 1, 0:W + 1, :], xv[0:TH + 1, 1:W + 2, :],
         xv[1:TH + 2, 0:W + 1, :], xv[1:TH + 2, 1:W + 2, :]], axis=-1)


# -------------------- pass 1: folded conv -> per-tile BN partial statistics --------------------
def _stats_kernel(xt_ref, wf_ref, psum_ref, psq_ref, *, TH, W, Cin, COP):
    """xt_ref : (1, TH+2, W+2, Cin) bf16   halo'd source tile (already zero-padded)
       wf_ref : (4, 4*Cin, COP)     bf16   folded weights, K packed as (rh, rw, ci)
       psum_ref, psq_ref : (1, 1, COP) f32 per-tile partial sums (grid axis is parallel)."""
    xv = xt_ref[0]
    xp4 = _pack_2x2(xv, TH, W)                               # (TH+1, W+1, 4*Cin)
    s = jnp.zeros((1, COP), jnp.float32)
    ss = jnp.zeros((1, COP), jnp.float32)
    for idx, (di, dj) in enumerate(SUBPOS):
        # Just-in-time patch: only the operands of the current matmul are live.
        patch = xp4[di:di + TH, dj:dj + W, :].reshape(TH * W, 4 * Cin)
        y = jnp.dot(patch, wf_ref[idx], preferred_element_type=jnp.float32)
        s = s + jnp.sum(y, axis=0, keepdims=True)
        ss = ss + jnp.sum(y * y, axis=0, keepdims=True)
    psum_ref[0] = s
    psq_ref[0] = ss


# ------------- pass 2: recompute conv + fused BN affine + ReLU, store Cout channels -------------
def _apply_kernel(xt_ref, wf_ref, scale_ref, shift_ref, o_ref, *, TH, W, Cin, Cout, COP):
    """o_ref: (1, 4, TH*W, Cout) f32, planar per sub-position (only real channels written)."""
    xv = xt_ref[0]
    xp4 = _pack_2x2(xv, TH, W)
    sc = scale_ref[...]                                      # (1, COP), hoisted out of the loop
    sh = shift_ref[...]
    for idx, (di, dj) in enumerate(SUBPOS):
        patch = xp4[di:di + TH, dj:dj + W, :].reshape(TH * W, 4 * Cin)
        y = jnp.dot(patch, wf_ref[idx], preferred_element_type=jnp.float32)
        y = jnp.maximum(y * sc + sh, 0.0)
        o_ref[0, idx] = y[:, :Cout]


def _pick_tile_h(H, W, Cin, Cout, COP, *, max_rows=64, vmem_budget=20 * 1024 * 1024):
    """Largest divisor of H (<= max_rows) whose per-step footprint fits a conservative VMEM
    budget (double-buffered input/output blocks + live in-kernel temporaries), so the chosen
    tile stays well under v7x's 64 MiB/TC while amortizing per-grid-step overhead."""
    def est(th):
        in_b = (th + 2) * (W + 2) * Cin * 2            # bf16 halo tile
        pack_b = (th + 1) * (W + 1) * 4 * Cin * 2      # packed 2x2-window tile
        patch_b = th * W * 4 * Cin * 2                 # live LHS patch
        acc_b = th * W * COP * 4                       # live matmul result (f32)
        out_b = 4 * th * W * Cout * 4                  # pass-2 output block (f32, Cout only)
        return 2 * (in_b + out_b) + pack_b + 2 * (patch_b + acc_b)
    for cand in range(min(H, max_rows), 0, -1):
        if H % cand == 0 and est(cand) <= vmem_budget:
            return cand
    return 1


def up_conv_forward(x_nchw, weight, bias, gamma, beta, *, tile_h=None):
    """x_nchw: (N, Cin, H, W); weight: (Cout, Cin, 3, 3); bias/gamma/beta: (Cout,)."""
    N, Cin, H, W = x_nchw.shape
    Cout = weight.shape[0]
    del bias  # conv bias cancels exactly under training-mode BatchNorm (only shifts the mean)

    COP = ((Cout + 127) // 128) * 128                 # lane-dense padded width for MXU/stats
    TH = tile_h if tile_h is not None else _pick_tile_h(H, W, Cin, Cout, COP)
    assert H % TH == 0, "tile_h must divide H"
    nH = H // TH
    NT = N * nH
    H2, W2 = 2 * H, 2 * W
    Mtot = N * H2 * W2

    # ---- cheap XLA prep on the small ORIGINAL-resolution x (no upsample, no im2col) ----
    xh = jnp.transpose(x_nchw, (0, 2, 3, 1))                                   # NHWC
    xp = jnp.pad(xh, ((0, 0), (1, 1), (1, 1), (0, 0))).astype(jnp.bfloat16)    # halo pad
    if nH == 1:
        xt = xp                                        # whole image per tile: no halo copy
    else:
        # TODO(synk): replace this halo duplication with an overlapping-window (Element)
        # BlockSpec or a manual-DMA fetch; it copies x once more (x << output, so minor).
        xt = jnp.stack([xp[:, t * TH:t * TH + TH + 2] for t in range(nH)], axis=1)
        xt = xt.reshape(NT, TH + 2, W + 2, Cin)

    # ---- fold 3x3 taps over the nearest-2x structure; pack the 2x2 taps into K = 4*Cin ----
    # A[d, r, k] = 1 iff conv tap k (along one axis) contributes to fold-offset r for sub-pos d.
    A = jnp.array([[[1., 0., 0.], [0., 1., 1.]],
                   [[1., 1., 0.], [0., 0., 1.]]], dtype=jnp.float32)
    wf = jnp.einsum('dik,ejl,ockl->deijco', A, A, weight.astype(jnp.float32))
    wf = wf.reshape(4, 4 * Cin, Cout)                  # (sub-pos, (rh, rw, ci), Cout)
    wf_p = (jnp.zeros((4, 4 * Cin, COP), jnp.float32)
            .at[..., :Cout].set(wf)).astype(jnp.bfloat16)

    vmem_limit = 48 * 1024 * 1024                      # explicit; <= v7x 64 MiB/TC

    # ------------------ pass 1: per-tile partial BN statistics (no y written) ------------------
    kernel1 = functools.partial(_stats_kernel, TH=TH, W=W, Cin=Cin, COP=COP)
    psum, psq = pl.pallas_call(
        kernel1,
        out_shape=(jax.ShapeDtypeStruct((NT, 1, COP), jnp.float32),
                   jax.ShapeDtypeStruct((NT, 1, COP), jnp.float32)),
        grid_spec=pltpu.PrefetchScalarGridSpec(
            num_scalar_prefetch=0,
            grid=(NT,),
            in_specs=[
                pl.BlockSpec((1, TH + 2, W + 2, Cin), lambda t: (t, 0, 0, 0)),
                pl.BlockSpec((4, 4 * Cin, COP), lambda t: (0, 0, 0)),   # resident weights
            ],
            out_specs=[
                pl.BlockSpec((1, 1, COP), lambda t: (t, 0, 0)),         # per-tile partials
                pl.BlockSpec((1, 1, COP), lambda t: (t, 0, 0)),
            ],
        ),
        compiler_params=pltpu.CompilerParams(
            dimension_semantics=("parallel",),          # no shared accumulator -> megacore OK
            vmem_limit_bytes=vmem_limit,
        ),
    )(xt, wf_p)

    # ---- tiny per-channel reduction + BN folding in XLA (f32 tree over per-tile partials) ----
    ssum = jnp.sum(psum[:, 0, :], axis=0)
    ssq = jnp.sum(psq[:, 0, :], axis=0)
    mean = ssum / Mtot
    var = jnp.maximum(ssq / Mtot - mean * mean, 0.0)    # guarded E[y^2] - E[y]^2
    inv = jax.lax.rsqrt(var + EPS)
    gamma_p = jnp.zeros((COP,), jnp.float32).at[:Cout].set(gamma.astype(jnp.float32))
    beta_p = jnp.zeros((COP,), jnp.float32).at[:Cout].set(beta.astype(jnp.float32))
    scale = (gamma_p * inv).reshape(1, COP)
    shift = (beta_p - mean * gamma_p * inv).reshape(1, COP)

    # --------- pass 2: recompute conv + fused affine/ReLU, write only Cout channels ---------
    kernel2 = functools.partial(_apply_kernel, TH=TH, W=W, Cin=Cin, Cout=Cout, COP=COP)
    out_planar = pl.pallas_call(
        kernel2,
        out_shape=jax.ShapeDtypeStruct((NT, 4, TH * W, Cout), jnp.float32),
        grid_spec=pltpu.PrefetchScalarGridSpec(
            num_scalar_prefetch=0,
            grid=(NT,),
            in_specs=[
                pl.BlockSpec((1, TH + 2, W + 2, Cin), lambda t: (t, 0, 0, 0)),
                pl.BlockSpec((4, 4 * Cin, COP), lambda t: (0, 0, 0)),
                pl.BlockSpec((1, COP), lambda t: (0, 0)),               # resident scale
                pl.BlockSpec((1, COP), lambda t: (0, 0)),               # resident shift
            ],
            out_specs=pl.BlockSpec((1, 4, TH * W, Cout), lambda t: (t, 0, 0, 0)),
        ),
        compiler_params=pltpu.CompilerParams(
            dimension_semantics=("parallel",),
            vmem_limit_bytes=vmem_limit,
        ),
    )(xt, wf_p, scale, shift)

    # Un-planarize sub-positions + NHWC->NCHW in one XLA transpose of the Cout-sized output.
    # TODO(synk): fold this interleave into the pass-2 store (final-NCHW out_spec) when W2>=128.
    out = out_planar.reshape(N, nH, 2, 2, TH, W, Cout)
    out = jnp.transpose(out, (0, 6, 1, 4, 2, 5, 3))     # (N, Cout, nH, TH, 2, W, 2)
    return out.reshape(N, Cout, H2, W2)


def ref_forward(x, weight, bias, gamma, beta):
    """Pure-JAX reference mirroring the PyTorch module (training-mode BN)."""
    xu = jnp.repeat(jnp.repeat(x, 2, axis=2), 2, axis=3)
    y = jax.lax.conv_general_dilated(
        xu, weight, window_strides=(1, 1), padding=((1, 1), (1, 1)),
        dimension_numbers=('NCHW', 'OIHW', 'NCHW'),
        precision=jax.lax.Precision.HIGHEST) + bias[None, :, None, None]
    mean = jnp.mean(y, axis=(0, 2, 3), keepdims=True)
    var = jnp.mean((y - mean) ** 2, axis=(0, 2, 3), keepdims=True)
    y_hat = (y - mean) * jax.lax.rsqrt(var + EPS)
    return jnp.maximum(y_hat * gamma[None, :, None, None] + beta[None, :, None, None], 0.0)


if __name__ == "__main__":
    key = jax.random.PRNGKey(0)
    k_x, k_w, k_b, k_g, k_bt = jax.random.split(key, 5)

    N, Cin, H, W = 2, 4, 16, 16
    Cout = 8

    x = jax.random.normal(k_x, (N, Cin, H, W), dtype=jnp.float32)

    fan_in = Cin * 3 * 3
    bound = 1.0 / (fan_in ** 0.5)
    weight = jax.random.uniform(k_w, (Cout, Cin, 3, 3), jnp.float32, -bound, bound)
    bias = jax.random.uniform(k_b, (Cout,), jnp.float32, -bound, bound)
    gamma = 1.0 + 0.1 * jax.random.normal(k_g, (Cout,), jnp.float32)   # non-trivial BN affine
    beta = 0.1 * jax.random.normal(k_bt, (Cout,), jnp.float32)

    out = jax.block_until_ready(up_conv_forward(x, weight, bias, gamma, beta))
    ref = jax.block_until_ready(ref_forward(x, weight, bias, gamma, beta))

    assert out.shape == (N, Cout, 2 * H, 2 * W)
    assert out.dtype == jnp.float32
    # bf16 MXU inputs (packed patches + folded weights) vs f32 reference -> loosened tolerance.
    assert jnp.allclose(out, ref, rtol=3e-2, atol=3e-2), float(jnp.max(jnp.abs(out - ref)))
    print("KERNEL_OK")
</pallas_src>

<mosaic_0001>
module attributes {stable_mosaic.version = 11 : i64} {
  func.func @_stats_kernel(%arg0: i32, %arg1: memref<1x18x18x4xbf16, #tpu.memory_space<vmem>>, %arg2: memref<4x16x128xbf16, #tpu.memory_space<vmem>>, %arg3: memref<1x1x128xf32, #tpu.memory_space<vmem>>, %arg4: memref<1x1x128xf32, #tpu.memory_space<vmem>>) attributes {dimension_semantics = [#tpu.dimension_semantics<parallel>], iteration_bounds = array<i64: 2>, scalar_prefetch = 0 : i64, scratch_operands = 0 : i64, tpu.core_type = #tpu.core_type<tc>, window_params = [{transform_indices = @transform_0, window_bounds = array<i64: 1, 18, 18, 4>}, {pipeline_mode = #tpu.pipeline_mode<synchronous>, transform_indices = @transform_1, window_bounds = array<i64: 4, 16, 128>}, {transform_indices = @transform_2, window_bounds = array<i64: 1, 1, 128>}, {transform_indices = @transform_3, window_bounds = array<i64: 1, 1, 128>}]} {
    %c0 = arith.constant 0 : index
    %c0_0 = arith.constant 0 : index
    %c0_1 = arith.constant 0 : index
    %c0_2 = arith.constant 0 : index
    %0 = vector.load %arg1[%c0, %c0_0, %c0_1, %c0_2] : memref<1x18x18x4xbf16, #tpu.memory_space<vmem>>, vector<1x18x18x4xbf16>
    %1 = vector.shape_cast %0 : vector<1x18x18x4xbf16> to vector<18x18x4xbf16>
    %2 = vector.extract_strided_slice %1 {offsets = [0, 0, 0], sizes = [17, 17, 4], strides = [1, 1, 1]} : vector<18x18x4xbf16> to vector<17x17x4xbf16>
    %3 = vector.extract_strided_slice %1 {offsets = [0, 1, 0], sizes = [17, 17, 4], strides = [1, 1, 1]} : vector<18x18x4xbf16> to vector<17x17x4xbf16>
    %4 = vector.extract_strided_slice %1 {offsets = [1, 0, 0], sizes = [17, 17, 4], strides = [1, 1, 1]} : vector<18x18x4xbf16> to vector<17x17x4xbf16>
    %5 = vector.extract_strided_slice %1 {offsets = [1, 1, 0], sizes = [17, 17, 4], strides = [1, 1, 1]} : vector<18x18x4xbf16> to vector<17x17x4xbf16>
    %6 = tpu.concatenate %2, %3, %4, %5 in 2 : vector<17x17x4xbf16>, vector<17x17x4xbf16>, vector<17x17x4xbf16>, vector<17x17x4xbf16> -> vector<17x17x16xbf16>
    %cst = arith.constant 0.000000e+00 : f32
    %7 = vector.broadcast %cst : f32 to vector<1x128xf32>
    %cst_3 = arith.constant 0.000000e+00 : f32
    %8 = vector.broadcast %cst_3 : f32 to vector<1x128xf32>
    %9 = vector.extract_strided_slice %6 {offsets = [0, 0, 0], sizes = [16, 16, 16], strides = [1, 1, 1]} : vector<17x17x16xbf16> to vector<16x16x16xbf16>
    %10 = vector.shape_cast %9 : vector<16x16x16xbf16> to vector<256x16xbf16>
    %c0_4 = arith.constant 0 : index
    %c0_5 = arith.constant 0 : index
    %c0_6 = arith.constant 0 : index
    %11 = vector.load %arg2[%c0_4, %c0_5, %c0_6] : memref<4x16x128xbf16, #tpu.memory_space<vmem>>, vector<1x16x128xbf16>
    %12 = vector.shape_cast %11 : vector<1x16x128xbf16> to vector<16x128xbf16>
    %cst_7 = arith.constant dense<0.000000e+00> : vector<256x128xf32>
    %13 = tpu.matmul %10, %12, %cst_7 {dimension_numbers = #tpu.dot_dimension_numbers<[1], [0], [0], [1], [0, 0, 1, 1], [], []>} : vector<256x16xbf16>, vector<16x128xbf16>, vector<256x128xf32> -> vector<256x128xf32>
    %cst_8 = arith.constant dense<0.000000e+00> : vector<128xf32>
    %14 = vector.multi_reduction <add>, %13, %cst_8 [0] : vector<256x128xf32> to vector<128xf32>
    %15 = vector.shape_cast %14 : vector<128xf32> to vector<1x128xf32>
    %16 = arith.addf %7, %15 : vector<1x128xf32>
    %17 = arith.mulf %13, %13 : vector<256x128xf32>
    %cst_9 = arith.constant dense<0.000000e+00> : vector<128xf32>
    %18 = vector.multi_reduction <add>, %17, %cst_9 [0] : vector<256x128xf32> to vector<128xf32>
    %19 = vector.shape_cast %18 : vector<128xf32> to vector<1x128xf32>
    %20 = arith.addf %8, %19 : vector<1x128xf32>
    %21 = vector.extract_strided_slice %6 {offsets = [0, 1, 0], sizes = [16, 16, 16], strides = [1, 1, 1]} : vector<17x17x16xbf16> to vector<16x16x16xbf16>
    %22 = vector.shape_cast %21 : vector<16x16x16xbf16> to vector<256x16xbf16>
    %c1 = arith.constant 1 : index
    %c0_10 = arith.constant 0 : index
    %c0_11 = arith.constant 0 : index
    %23 = vector.load %arg2[%c1, %c0_10, %c0_11] : memref<4x16x128xbf16, #tpu.memory_space<vmem>>, vector<1x16x128xbf16>
    %24 = vector.shape_cast %23 : vector<1x16x128xbf16> to vector<16x128xbf16>
    %cst_12 = arith.constant dense<0.000000e+00> : vector<256x128xf32>
    %25 = tpu.matmul %22, %24, %cst_12 {dimension_numbers = #tpu.dot_dimension_numbers<[1], [0], [0], [1], [0, 0, 1, 1], [], []>} : vector<256x16xbf16>, vector<16x128xbf16>, vector<256x128xf32> -> vector<256x128xf32>
    %cst_13 = arith.constant dense<0.000000e+00> : vector<128xf32>
    %26 = vector.multi_reduction <add>, %25, %cst_13 [0] : vector<256x128xf32> to vector<128xf32>
    %27 = vector.shape_cast %26 : vector<128xf32> to vector<1x128xf32>
    %28 = arith.addf %16, %27 : vector<1x128xf32>
    %29 = arith.mulf %25, %25 : vector<256x128xf32>
    %cst_14 = arith.constant dense<0.000000e+00> : vector<128xf32>
    %30 = vector.multi_reduction <add>, %29, %cst_14 [0] : vector<256x128xf32> to vector<128xf32>
    %31 = vector.shape_cast %30 : vector<128xf32> to vector<1x128xf32>
    %32 = arith.addf %20, %31 : vector<1x128xf32>
    %33 = vector.extract_strided_slice %6 {offsets = [1, 0, 0], sizes = [16, 16, 16], strides = [1, 1, 1]} : vector<17x17x16xbf16> to vector<16x16x16xbf16>
    %34 = vector.shape_cast %33 : vector<16x16x16xbf16> to vector<256x16xbf16>
    %c2 = arith.constant 2 : index
    %c0_15 = arith.constant 0 : index
    %c0_16 = arith.constant 0 : index
    %35 = vector.load %arg2[%c2, %c0_15, %c0_16] : memref<4x16x128xbf16, #tpu.memory_space<vmem>>, vector<1x16x128xbf16>
    %36 = vector.shape_cast %35 : vector<1x16x128xbf16> to vector<16x128xbf16>
    %cst_17 = arith.constant dense<0.000000e+00> : vector<256x128xf32>
    %37 = tpu.matmul %34, %36, %cst_17 {dimension_numbers = #tpu.dot_dimension_numbers<[1], [0], [0], [1], [0, 0, 1, 1], [], []>} : vector<256x16xbf16>, vector<16x128xbf16>, vector<256x128xf32> -> vector<256x128xf32>
    %cst_18 = arith.constant dense<0.000000e+00> : vector<128xf32>
    %38 = vector.multi_reduction <add>, %37, %cst_18 [0] : vector<256x128xf32> to vector<128xf32>
    %39 = vector.shape_cast %38 : vector<128xf32> to vector<1x128xf32>
    %40 = arith.addf %28, %39 : vector<1x128xf32>
    %41 = arith.mulf %37, %37 : vector<256x128xf32>
    %cst_19 = arith.constant dense<0.000000e+00> : vector<128xf32>
    %42 = vector.multi_reduction <add>, %41, %cst_19 [0] : vector<256x128xf32> to vector<128xf32>
    %43 = vector.shape_cast %42 : vector<128xf32> to vector<1x128xf32>
    %44 = arith.addf %32, %43 : vector<1x128xf32>
    %45 = vector.extract_strided_slice %6 {offsets = [1, 1, 0], sizes = [16, 16, 16], strides = [1, 1, 1]} : vector<17x17x16xbf16> to vector<16x16x16xbf16>
    %46 = vector.shape_cast %45 : vector<16x16x16xbf16> to vector<256x16xbf16>
    %c3 = arith.constant 3 : index
    %c0_20 = arith.constant 0 : index
    %c0_21 = arith.constant 0 : index
    %47 = vector.load %arg2[%c3, %c0_20, %c0_21] : memref<4x16x128xbf16, #tpu.memory_space<vmem>>, vector<1x16x128xbf16>
    %48 = vector.shape_cast %47 : vector<1x16x128xbf16> to vector<16x128xbf16>
    %cst_22 = arith.constant dense<0.000000e+00> : vector<256x128xf32>
    %49 = tpu.matmul %46, %48, %cst_22 {dimension_numbers = #tpu.dot_dimension_numbers<[1], [0], [0], [1], [0, 0, 1, 1], [], []>} : vector<256x16xbf16>, vector<16x128xbf16>, vector<256x128xf32> -> vector<256x128xf32>
    %cst_23 = arith.constant dense<0.000000e+00> : vector<128xf32>
    %50 = vector.multi_reduction <add>, %49, %cst_23 [0] : vector<256x128xf32> to vector<128xf32>
    %51 = vector.shape_cast %50 : vector<128xf32> to vector<1x128xf32>
    %52 = arith.addf %40, %51 : vector<1x128xf32>
    %53 = arith.mulf %49, %49 : vector<256x128xf32>
    %cst_24 = arith.constant dense<0.000000e+00> : vector<128xf32>
    %54 = vector.multi_reduction <add>, %53, %cst_24 [0] : vector<256x128xf32> to vector<128xf32>
    %55 = vector.shape_cast %54 : vector<128xf32> to vector<1x128xf32>
    %56 = arith.addf %44, %55 : vector<1x128xf32>
    %c0_25 = arith.constant 0 : index
    %c0_26 = arith.constant 0 : index
    %c0_27 = arith.constant 0 : index
    %57 = vector.load %arg3[%c0_25, %c0_26, %c0_27] : memref<1x1x128xf32, #tpu.memory_space<vmem>>, vector<1x1x128xf32>
    %58 = vector.shape_cast %57 : vector<1x1x128xf32> to vector<1x128xf32>
    %59 = vector.shape_cast %52 : vector<1x128xf32> to vector<1x1x128xf32>
    tpu.vector_store %arg3[%c0_25, %c0_26, %c0_27], %59 {strides = array<i32>} : memref<1x1x128xf32, #tpu.memory_space<vmem>>, vector<1x1x128xf32>,
    %c0_28 = arith.constant 0 : index
    %c0_29 = arith.constant 0 : index
    %c0_30 = arith.constant 0 : index
    %60 = vector.load %arg4[%c0_28, %c0_29, %c0_30] : memref<1x1x128xf32, #tpu.memory_space<vmem>>, vector<1x1x128xf32>
    %61 = vector.shape_cast %60 : vector<1x1x128xf32> to vector<1x128xf32>
    %62 = vector.shape_cast %56 : vector<1x128xf32> to vector<1x1x128xf32>
    tpu.vector_store %arg4[%c0_28, %c0_29, %c0_30], %62 {strides = array<i32>} : memref<1x1x128xf32, #tpu.memory_space<vmem>>, vector<1x1x128xf32>,
    return
  }
  func.func @transform_0(%arg0: i32) -> (i32, i32, i32, i32) {
    %c0_i32 = arith.constant 0 : i32
    %c0_i32_0 = arith.constant 0 : i32
    %c0_i32_1 = arith.constant 0 : i32
    %c0_i32_2 = arith.constant 0 : i32
    return %arg0, %c0_i32, %c0_i32_0, %c0_i32_1 : i32, i32, i32, i32
  }
  func.func @transform_1(%arg0: i32) -> (i32, i32, i32) {
    %c0_i32 = arith.constant 0 : i32
    %c0_i32_0 = arith.constant 0 : i32
    %c0_i32_1 = arith.constant 0 : i32
    %c0_i32_2 = arith.constant 0 : i32
    return %c0_i32, %c0_i32_0, %c0_i32_1 : i32, i32, i32
  }
  func.func @transform_2(%arg0: i32) -> (i32, i32, i32) {
    %c0_i32 = arith.constant 0 : i32
    %c0_i32_0 = arith.constant 0 : i32
    %c0_i32_1 = arith.constant 0 : i32
    return %arg0, %c0_i32, %c0_i32_0 : i32, i32, i32
  }
  func.func @transform_3(%arg0: i32) -> (i32, i32, i32) {
    %c0_i32 = arith.constant 0 : i32
    %c0_i32_0 = arith.constant 0 : i32
    %c0_i32_1 = arith.constant 0 : i32
    return %arg0, %c0_i32, %c0_i32_0 : i32, i32, i32
  }
}

</mosaic_0001>

<bundles_post_ra>
// kernel: tpu_custom_call.1
= control target key start
LH: loop header
LB: loop body
LE: loop exit
PB: predicated region body
PF: predicated region fallthrough
CT: control target
= control target key end

     0   :  { %9 = vsyncpa [#allocation3], 0  ;;  %s3442_s0 = inlined_call_operand.vmem [shape: bf16[2,18,18,4], index: 0, kind: input, shape index: {}]   ;;  %s3443_s1 = inlined_call_operand.vmem [shape: bf16[4,16,128], index: 1, kind: input, shape index: {}]   ;;  %s3444_s2 = inlined_call_operand.hbm [shape: f32[2,1,128], index: 2, kind: output, shape index: {0}]   ;;  %s3445_s3 = inlined_call_operand.hbm [shape: f32[2,1,128], index: 3, kind: output, shape index: {1}]  }
   0x1   :  { %11 = vsyncpa [#allocation3 + $0x1], 0 }
   0x2   :  { %12 = vsyncpa [#allocation5], 0 }
   0x3   :  { %14 = vsyncpa [#allocation5 + $0x1], 0  ;;  %s2589_s12 = smov 0   ;;  %s2591_s13 = smov 0  }
   0x4   :  { %s2593_s14 = smov 0   ;;  %s2595_s15 = smov 0  }
   0x5 LB: > { %s2610_s16 = sadd.s32 4294967295, %s2564_s15   ;;  %s2235_s17 = sadd.s32 4294967294, %s2564_s15   ;;  %s2564_s15 = sphi %s2595_s15, %s3451_s15   ;;  %s2560_s14 = sphi %s2593_s14, %s3450_s14   ;;  %s2556_s13 = sphi %s2591_s13, %s3449_s13   ;;  %s2552_s12 = sphi %s2589_s12, %s3448_s12  }
   0x6   : > { %s2614_s18 = sadd.s32 1, %s2564_s15   ;;  %s74_s19 = sadd.s32 1, %s2560_s14 }
   0x7   : > { %s71_s20 = ssub.s32 %s2564_s15, %s2614_s18  ;;  %p84_p0 = scmp.ne.s32.totalorder %s2560_s14, %s2556_s13 }
   0x8   : > { %p72_p1 = scmp.eq.s32.totalorder %s71_s20, 0  ;;  %p85_p2 = scmp.eq.s32.totalorder %s2610_s16, 1 }
   0x9   : > { %p90_p3 = scmp.ne.s32.totalorder %s2556_s13, %s2552_s12  ;;  %p91_p4 = scmp.eq.s32.totalorder %s2235_s17, 1 }
   0xa   : > { %s2625_s21 = scalar_select %p72_p1, %s2560_s14, %s74_s19  }
   0xb   : > { %p2627_p5 = por %p85_p2, %p84_p0  ;;  %p2631_p6 = por %p91_p4, %p90_p3 }
   0xc   : > { %p2238_p7 = scmp.ge.s32.totalorder %s2564_s15, 1  ;;  %p146_p8 = scmp.lt.s32.totalorder %s2564_s15, 3 }
   0xe   : > { %p147_p9 = pnand %p2238_p7, %p146_p8 }
   0xf   : > { %p173_p10 = scmp.lt.s32.totalorder (!%p147_p9), %s2610_s16, 1  ;;  %s2566_s29 = smov (!%p147_p9), 8  }
  0x10   : > { %150 = sbr.rel (%p147_p9) target bundleno = 590 (0x24e), region = 28  ;;  %s2567_s30 = smov (!%p147_p9), 4  }
  0x11   : > { %s2568_s4 = smov (!%p147_p9), 12   ;;  %s3373_s19 = sand.u32 (!%p147_p9), 1, %s2556_s13  }
  0x12   : > { %s172_s5 = scalar_lea.vmem (!%p147_p9), [#allocation4], %s3373_s19  ;;  %s2490_s17 = scalar_lea.hbm (!%p147_p9), %s3444_s2, 2 }
  0x13   : > { %s3389_s6 = sshll.u32 (!%p147_p9), %s172_s5, 4  ;;  %s2151_s6 = int_to_ptr.vmem [resolvable:$true] %s3389_s6 }
  0x15   : > { %s174_s24 = scalar_select %p173_p10, %s2610_s16, 1  ;;  %vm369_vm0 = vsmask.f32 7424  ;;  %vm834_vm1 = vcmask 31744   ;;  %vm972_vm2 = vcmask 97280   ;;  %vm903_vm3 = vcmask 64512  }
  0x16   : > { %vm1049_vm4 = vcmask 130048  }
  0x17   : > { %s2422_s25 = smul.u32 216, %s174_s24 }
  0x19   : > { %s2642_s28 = scalar_lea.vmem %s3442_s0, %s2422_s25  ;;  %s2135_s25 = scalar_lea.hbm %s3444_s2, %s2610_s16 }
  0x1a   : > { %v2645_v0 = vld [vmem:[%s2642_s28 + $0x18] sm:$0xff]  ;;  %v184_v1 = vld [vmem:[%s2642_s28 + $0x14] sm:$0x1]  ;;  %v187_v2 = vld [vmem:[%s2642_s28 + $0x20] sm:$0x1] }
  0x1b   : > { %v289_v3 = vunpack.c.l.b16 %v184_v1  ;;  %v292_v4 = vunpack.c.l.b16 %v187_v2  ;;  %v181_v5 = vld [vmem:[%s2642_s28 + $0x8] sm:$0x1]  ;;  %v2651_v6 = vld [vmem:[%s2642_s28 + $0xc] sm:$0xff]  ;;  %688 = vrot.lane.b32.xlu0 %v2645_v0, %s2566_s29  ;;  %v401_v8 = vshll.u32 %v2645_v0, 16  ;;  %v399_v11 = vshrl.u32 %v2645_v0, 16  ;;  %v2663_v12 = vld [vmem:[%s2642_s28] sm:$0xff] }
  0x1c   : > { %v286_v7 = vunpack.c.l.b16 %v181_v5  ;;  %v387_v10 = vshll.u32 %v2651_v6, 16  ;;  %684 = vrot.lane.b32.xlu2 %v2651_v6, %s2566_s29  ;;  %v385_v17 = vshrl.u32 %v2651_v6, 16  ;;  %v373_v22 = vshll.u32 %v2663_v12, 16  ;;  %v190_v35 = vld [vmem:[%s2642_s28 + $0x2c] sm:$0x1]  ;;  %v2691_v37 = vld [vmem:[%s2642_s28 + $0x24] sm:$0xff] }
  0x1d   : > { %v2656_v9 = vpack.c.b16 %v289_v3, %v289_v3  ;;  %v403_v13 = vrot.slane %v401_v8, 1  ;;  %v2666_v15 = vpack.c.b16 %v292_v4, %v292_v4  ;;  %v371_v28 = vshrl.u32 %v2663_v12, 16  ;;  %v193_v46 = vld [vmem:[%s2642_s28 + $0x38] sm:$0x1]  ;;  %v2709_v48 = vld [vmem:[%s2642_s28 + $0x30] sm:$0xff]  ;;  %v2728_v60 = vld [vmem:[%s2642_s28 + $0x3c] sm:$0xff] }
  0x1e   : > { %v2668_v16 = vpack.c.b16 %v286_v7, %v286_v7  ;;  %v389_v18 = vrot.slane %v387_v10, 1  ;;  %v375_v29 = vrot.slane %v373_v22, 1  ;;  %v295_v38 = vunpack.c.l.b16 %v190_v35  ;;  %v196_v58 = vld [vmem:[%s2642_s28 + $0x44] sm:$0x1]  ;;  %v199_v8 = vld [vmem:[%s2642_s28 + $0x50] sm:$0x1] }
  0x1f   : > { %v396_v14 = vshrl.u32 %v2656_v9, 16  ;;  %v392_v19 = vshll.u32 %v2656_v9, 16  ;;  %v404_v20 = vor.u32 %v403_v13, %v399_v11  ;;  %v406_v21 = vshll.u32 %v2666_v15, 16  ;;  %v2747_v11 = vld [vmem:[%s2642_s28 + $0x48] sm:$0xff] }
  0x20   : > { %v382_v24 = vshrl.u32 %v2668_v16, 16  ;;  %v390_v25 = vor.u32 %v389_v18, %v385_v17  ;;  %v378_v30 = vshll.u32 %v2668_v16, 16  ;;  %v376_v32 = vor.u32 %v375_v29, %v371_v28 }
  0x21   : > { %614 = vrot.lane.b32.xlu1 %v396_v14, %s2567_s30  ;;  %v408_v23 = vrot.slane %v406_v21, 1  ;;  %v394_v26 = vrot.slane %v392_v19, 1  ;;  %v410_v36 = vshrl.u32 %v2666_v15, 16  ;;  %v2694_v39 = vpack.c.b16 %v295_v38, %v295_v38  ;;  %v2420_v38 = vld [vmem:[%s3443_s1 + $0x10] sm:$0xff] }
  0x22   : > { %v380_v33 = vrot.slane %v378_v30, 1  ;;  %v415_v40 = vshll.u32 %v2691_v37, 16  ;;  %v413_v41 = vshrl.u32 %v2691_v37, 16  ;;  %v298_v49 = vunpack.c.l.b16 %v193_v46  ;;  %1711 = vmatpush.bf16.msra.mxu2 %v2420_v38  ;;  %v2418_v46 = vld [vmem:[%s3443_s1] sm:$0xff] }
  0x23   : > { %690 = vrot.lane.b32.xlu0 %v2666_v15, %s2566_s29  ;;  %v409_v27 = vsel %vm369_vm0, %v404_v20, %v408_v23  ;;  %v395_v31 = vsel %vm369_vm0, %v390_v25, %v394_v26  ;;  %v420_v43 = vshll.u32 %v2694_v39, 16  ;;  %v424_v50 = vshrl.u32 %v2694_v39, 16  ;;  %v2766_v26 = vld [vmem:[%s2642_s28 + $0x54] sm:$0xff]  ;;  %1089 = vmatpush.bf16.msra.mxu0 %v2418_v46 }
  0x24   : > { %770 = vrot.lane.b32.xlu2 %v409_v27, %s2568_s4  ;;  %v381_v34 = vsel %vm369_vm0, %v376_v32, %v380_v33  ;;  %v417_v42 = vrot.slane %v415_v40, 1  ;;  %v2713_v51 = vpack.c.b16 %v298_v49, %v298_v49  ;;  %v429_v52 = vshll.u32 %v2709_v48, 16  ;;  %v205_v40 = vld [vmem:[%s2642_s28 + $0x68] sm:$0x1] }
  0x25   : > { %v422_v45 = vrot.slane %v420_v43, 1  ;;  %v427_v53 = vshrl.u32 %v2709_v48, 16  ;;  %v301_v61 = vunpack.c.l.b16 %v196_v58  ;;  %v443_v1 = vshll.u32 %v2728_v60, 16  ;;  %v2790_v43 = vld [vmem:[%s2642_s28 + $0x60] sm:$0xff] }
  0x26   : > { %v418_v44 = vor.u32 %v417_v42, %v413_v41  ;;  %v431_v54 = vrot.slane %v429_v52, 1  ;;  %v434_v55 = vshll.u32 %v2713_v51, 16  ;;  %v438_v62 = vshrl.u32 %v2713_v51, 16  ;;  %v2421_v52 = vld [vmem:[%s3443_s1 + $0x18] sm:$0xff] }
  0x27   : > { %v2732_v63 = vpack.c.b16 %v301_v61, %v301_v61  ;;  %v441_v2 = vshrl.u32 %v2728_v60, 16  ;;  %v445_v3 = vrot.slane %v443_v1, 1  ;;  %v304_v13 = vunpack.c.l.b16 %v199_v8  ;;  %1930 = vmatpush.bf16.msra.mxu3 %v2421_v52  ;;  %v2419_v61 = vld [vmem:[%s3443_s1 + $0x8] sm:$0xff] }
  0x28   : > { %v423_v47 = vsel %vm369_vm0, %v418_v44, %v422_v45  ;;  %v432_v56 = vor.u32 %v431_v54, %v427_v53  ;;  %v436_v57 = vrot.slane %v434_v55, 1  ;;  %v457_v18 = vshll.u32 %v2747_v11, 16  ;;  %1503 = vmatpush.bf16.msra.mxu1 %v2419_v61 }
  0x29   : > { %610 = vrot.lane.b32.xlu1 %v382_v24, %s2567_s30  ;;  %v448_v4 = vshll.u32 %v2732_v63, 16  ;;  %v446_v5 = vor.u32 %v445_v3, %v441_v2  ;;  %v2751_v17 = vpack.c.b16 %v304_v13, %v304_v13  ;;  %v455_v19 = vshrl.u32 %v2747_v11, 16  ;;  %v202_v24 = vld [vmem:[%s2642_s28 + $0x5c] sm:$0x1]  ;;  %v2822_v2 = vld [vmem:[%s2642_s28 + $0x6c] sm:$0xff] }
  0x2a   : > { %v437_v59 = vsel %vm369_vm0, %v432_v56, %v436_v57  ;;  %v459_v20 = vrot.slane %v457_v18, 1  ;;  %v471_v30 = vshll.u32 %v2766_v26, 16  ;;  %v469_v32 = vshrl.u32 %v2766_v26, 16 }
  0x2b   : > { %612 = vrot.lane.b32.xlu0 %v395_v31, %s2567_s30  ;;  %v450_v7 = vrot.slane %v448_v4, 1  ;;  %v462_v21 = vshll.u32 %v2751_v17, 16  ;;  %v466_v28 = vshrl.u32 %v2751_v17, 16  ;;  %v310_v44 = vunpack.c.l.b16 %v205_v40 }
  0x2c   : > { %766 = vrot.lane.b32.xlu2 %v395_v31, %s2568_s4  ;;  %v460_v22 = vor.u32 %v459_v20, %v455_v19  ;;  %v473_v33 = vrot.slane %v471_v30, 1  ;;  %v485_v49 = vshll.u32 %v2790_v43, 16  ;;  %v483_v53 = vshrl.u32 %v2790_v43, 16 }
  0x2d   : > { %v451_v10 = vsel %vm369_vm0, %v446_v5, %v450_v7  ;;  %v464_v23 = vrot.slane %v462_v21, 1  ;;  %v499_v8 = vshll.u32 %v2822_v2, 16 }
  0x2e   : > { %v474_v35 = vor.u32 %v473_v33, %v469_v32  ;;  %v487_v54 = vrot.slane %v485_v49, 1  ;;  %v2851_v33 = vld [vmem:[%s2642_s28 + $0x78] sm:$0xff] }
  0x2f   : > { %v465_v25 = vsel %vm369_vm0, %v460_v22, %v464_v23  ;;  %v501_v18 = vrot.slane %v499_v8, 1 }
  0x30   : > { %v488_v56 = vor.u32 %v487_v54, %v483_v53 }
  0x31   : > { %608 = vrot.lane.b32.xlu1 %v381_v34, %s2567_s30 }
  0x33   : > { %772 = vrot.lane.b32.xlu0 %v410_v36, %s2568_s4 }
  0x34   : > { %768 = vrot.lane.b32.xlu2 %v396_v14, %s2568_s4  ;;  %v452_v14 = vshrl.u32 %v2732_v63, 16 }
  0x39   : > { %686 = vrot.lane.b32.xlu1 %v2656_v9, %s2566_s29 }
  0x3b   : > { %616 = vrot.lane.b32.xlu0 %v409_v27, %s2567_s30  ;;  %v307_v27 = vunpack.c.l.b16 %v202_v24  ;;  %v211_v24 = vld [vmem:[%s2642_s28 + $0x80] sm:$0x1] }
  0x3c   : > { %618 = vrot.lane.b32.xlu2 %v410_v36, %s2567_s30 }
  0x3d   : > { %v2770_v29 = vpack.c.b16 %v307_v27, %v307_v27 }
  0x3f   : > { %v476_v34 = vshll.u32 %v2770_v29, 16  ;;  %v480_v45 = vshrl.u32 %v2770_v29, 16 }
  0x41   : > { %692 = vrot.lane.b32.xlu1 %v2691_v37, %s2566_s29  ;;  %v478_v36 = vrot.slane %v476_v34, 1  ;;  %v316_v34 = vunpack.c.l.b16 %v211_v24 }
  0x43   : > { %774 = vrot.lane.b32.xlu0 %v423_v47, %s2568_s4  ;;  %v479_v42 = vsel %vm369_vm0, %v474_v35, %v478_v36 }
  0x44   : > { %776 = vrot.lane.b32.xlu2 %v424_v50, %s2568_s4 }
  0x49   : > { %694 = vrot.lane.b32.xlu1 %v2694_v39, %s2566_s29 }
  0x4b   : > { %620 = vrot.lane.b32.xlu0 %v423_v47, %s2567_s30  ;;  %v2797_v47 = vpack.c.b16 %v310_v44, %v310_v44  ;;  %v513_v44 = vshll.u32 %v2851_v33, 16 }
  0x4c   : > { %622 = vrot.lane.b32.xlu2 %v424_v50, %s2567_s30 }
  0x4d   : > { %v490_v55 = vshll.u32 %v2797_v47, 16  ;;  %v494_v4 = vshrl.u32 %v2797_v47, 16 }
  0x4f   : > { %v492_v57 = vrot.slane %v490_v55, 1  ;;  %v511_v55 = vshrl.u32 %v2851_v33, 16 }
  0x51   : > { %696 = vrot.lane.b32.xlu1 %v2709_v48, %s2566_s29  ;;  %v493_v1 = vsel %vm369_vm0, %v488_v56, %v492_v57  ;;  %v515_v56 = vrot.slane %v513_v44, 1 }
  0x53   : > { %778 = vrot.lane.b32.xlu0 %v437_v59, %s2568_s4  ;;  %v516_v8 = vor.u32 %v515_v56, %v511_v55 }
  0x54   : > { %780 = vrot.lane.b32.xlu2 %v438_v62, %s2568_s4 }
  0x59   : > { %698 = vrot.lane.b32.xlu1 %v2713_v51, %s2566_s29 }
  0x5b   : > { %624 = vrot.lane.b32.xlu0 %v437_v59, %s2567_s30  ;;  %v208_v59 = vld [vmem:[%s2642_s28 + $0x74] sm:$0x1] }
  0x5c   : > { %626 = vrot.lane.b32.xlu2 %v438_v62, %s2567_s30  ;;  %v313_v3 = vunpack.c.l.b16 %v208_v59 }
  0x5e   : > { %v2826_v7 = vpack.c.b16 %v313_v3, %v313_v3 }
  0x60   : > { %v504_v19 = vshll.u32 %v2826_v7, 16 }
  0x61   : > { %700 = vrot.lane.b32.xlu1 %v2728_v60, %s2566_s29 }
  0x62   : > { %v506_v22 = vrot.slane %v504_v19, 1 }
  0x63   : > { %782 = vrot.lane.b32.xlu0 %v451_v10, %s2568_s4 }
  0x64   : > { %784 = vrot.lane.b32.xlu2 %v452_v14, %s2568_s4 }
  0x69   : > { %702 = vrot.lane.b32.xlu1 %v2732_v63, %s2566_s29 }
  0x6b   : > { %628 = vrot.lane.b32.xlu0 %v451_v10, %s2567_s30 }
  0x6c   : > { %630 = vrot.lane.b32.xlu2 %v452_v14, %s2567_s30  ;;  %v497_v14 = vshrl.u32 %v2822_v2, 16 }
  0x6e   : > { %v502_v21 = vor.u32 %v501_v18, %v497_v14 }
  0x70   : > { %v507_v32 = vsel %vm369_vm0, %v502_v21, %v506_v22 }
  0x71   : > { %704 = vrot.lane.b32.xlu1 %v2747_v11, %s2566_s29 }
  0x73   : > { %786 = vrot.lane.b32.xlu0 %v465_v25, %s2568_s4 }
  0x74   : > { %788 = vrot.lane.b32.xlu2 %v466_v28, %s2568_s4 }
  0x76   : > { %v2774_v31 = vpop.permute.xlu2 %684 }
  0x79   : > { %706 = vrot.lane.b32.xlu1 %v2751_v17, %s2566_s29 }
  0x7b   : > { %632 = vrot.lane.b32.xlu0 %v465_v25, %s2567_s30 }
  0x7c   : > { %634 = vrot.lane.b32.xlu2 %v466_v28, %s2567_s30 }
  0x7e   : > { %v771_v41 = vpop.permute.xlu2 %770 }
  0x81   : > { %708 = vrot.lane.b32.xlu1 %v2766_v26, %s2566_s29 }
  0x83   : > { %790 = vrot.lane.b32.xlu0 %v479_v42, %s2568_s4 }
  0x84   : > { %792 = vrot.lane.b32.xlu2 %v480_v45, %s2568_s4 }
  0x86   : > { %v2801_v50 = vpop.permute.xlu2 %766 }
  0x89   : > { %710 = vrot.lane.b32.xlu1 %v2770_v29, %s2566_s29 }
  0x8b   : > { %636 = vrot.lane.b32.xlu0 %v479_v42, %s2567_s30  ;;  %v2864_v42 = vpack.c.b16 %v316_v34, %v316_v34 }
  0x8c   : > { %638 = vrot.lane.b32.xlu2 %v480_v45, %s2567_s30 }
  0x8d   : > { %v689_v58 = vpop.permute.xlu0 %688 }
  0x8e   : > { %v2816_v62 = vpop.permute.xlu2 %768 }
  0x91   : > { %712 = vrot.lane.b32.xlu1 %v2790_v43, %s2566_s29 }
  0x93   : > { %v615_v5 = vpop.permute.xlu1 %614  ;;  %794 = vrot.lane.b32.xlu0 %v493_v1, %s2568_s4 }
  0x94   : > { %796 = vrot.lane.b32.xlu2 %v494_v4, %s2568_s4  ;;  %v842_v40 = vsel %vm834_vm1, %v2656_v9, %v615_v5 }
  0x95   : > { %v691_v10 = vpop.permute.xlu0 %690 }
  0x96   : > { %v2830_v13 = vpop.permute.xlu2 %618  ;;  %v911_v45 = vsel %vm903_vm3, %v842_v40, %v691_v10 }
  0x99   : > { %714 = vrot.lane.b32.xlu1 %v2797_v47, %s2566_s29 }
  0x9b   : > { %v611_v20 = vpop.permute.xlu1 %610  ;;  %640 = vrot.lane.b32.xlu0 %v493_v1, %s2567_s30 }
  0x9c   : > { %642 = vrot.lane.b32.xlu2 %v494_v4, %s2567_s30  ;;  %v838_v59 = vsel %vm834_vm1, %v2668_v16, %v611_v20  ;;  %v214_v16 = vld [vmem:[%s2642_s28 + $0x8c] sm:$0x1] }
  0x9d   : > { %v613_v23 = vpop.permute.xlu0 %612  ;;  %v319_v24 = vunpack.c.l.b16 %v214_v16 }
  0x9e   : > { %v840_v25 = vsel %vm834_vm1, %v2651_v6, %v613_v23  ;;  %v2842_v28 = vpop.permute.xlu2 %776  ;;  %v508_v6 = vshrl.u32 %v2826_v7, 16 }
  0x9f   : > { %v909_v27 = vsel %vm903_vm3, %v840_v25, %v689_v58 }
  0xa0   : > { %v2847_v30 = vsel %vm972_vm2, %v909_v27, %v771_v41  ;;  %v522_v27 = vshrl.u32 %v2864_v42, 16 }
  0xa1   : > { %716 = vrot.lane.b32.xlu1 %v2822_v2, %s2566_s29  ;;  %v1291_v35 = vshll.u32 %v2847_v30, 16  ;;  %2360 = vmatmul.msk.bf16.vlgmr.msra.gmra.mxu2 %vm1049_vm4, %v2847_v30  ;;  %v1289_v9 = vshrl.u32 %v2847_v30, 16 }
  0xa3   : > { %v609_v36 = vpop.permute.xlu1 %608  ;;  %798 = vrot.lane.b32.xlu0 %v507_v32, %s2568_s4  ;;  %v1293_v46 = vrot.slane %v1291_v35, 1  ;;  %v2904_v35 = vpack.c.b16 %v319_v24, %v319_v24 }
  0xa4   : > { %v836_v38 = vsel %vm834_vm1, %v2663_v12, %v609_v36  ;;  %800 = vrot.lane.b32.xlu2 %v508_v6, %s2568_s4 }
  0xa5   : > { %v905_v41 = vsel %vm903_vm3, %v836_v38, %v2774_v31  ;;  %v773_v49 = vpop.permute.xlu0 %772  ;;  %v1294_v58 = vor.u32 %v1293_v46, %v1289_v9  ;;  %v532_v46 = vshll.u32 %v2904_v35, 16 }
  0xa6   : > { %v974_v52 = vsel %vm972_vm2, %v905_v41, %v2801_v50  ;;  %v980_v12 = vsel %vm972_vm2, %v911_v45, %v773_v49  ;;  %v2874_v54 = vpop.permute.xlu2 %622  ;;  %v518_v50 = vshll.u32 %v2864_v42, 16  ;;  %v846_v49 = vsel %vm834_vm1, %v2666_v15, %v2830_v13 }
  0xa7   : > { %2316 = vmatmul.msk.bf16.vlgmr.msra.gmra.mxu0 %vm1049_vm4, %v974_v52  ;;  %v1295_v31 = vshll.u32 %v980_v12, 16  ;;  %v1281_v53 = vshll.u32 %v974_v52, 16  ;;  %v1279_v14 = vshrl.u32 %v974_v52, 16  ;;  %v850_v24 = vsel %vm834_vm1, %v2694_v39, %v2874_v54 }
  0xa8   : > { %v520_v10 = vrot.slane %v518_v50, 1 }
  0xa9   : > { %718 = vrot.lane.b32.xlu1 %v2826_v7, %s2566_s29  ;;  %v1297_v57 = vrot.slane %v1295_v31, 1  ;;  %v1283_v1 = vrot.slane %v1281_v53, 1  ;;  %v534_v53 = vrot.slane %v532_v46, 1 }
  0xaa   : > { %v521_v23 = vsel %vm369_vm0, %v516_v8, %v520_v10 }
  0xab   : > { %v687_v61 = vpop.permute.xlu1 %686  ;;  %644 = vrot.lane.b32.xlu0 %v507_v32, %s2567_s30  ;;  %v1298_v4 = vsel %vm369_vm0, %v1294_v58, %v1297_v57  ;;  %v1284_v20 = vor.u32 %v1283_v1, %v1279_v14  ;;  %v217_v57 = vld [vmem:[%s2642_s28 + $0x98] sm:$0x1] }
  0xac   : > { %v907_v3 = vsel %vm903_vm3, %v838_v59, %v687_v61  ;;  %2382 = vmatmul.msk.bf16.vlgmr.msra.gmra.mxu3 %vm1049_vm4, %v1298_v4  ;;  %646 = vrot.lane.b32.xlu2 %v508_v6, %s2567_s30  ;;  %v2934_v61 = vld [vmem:[%s2642_s28 + $0x90] sm:$0xff] }
  0xad   : > { %v976_v5 = vsel %vm972_vm2, %v907_v3, %v2816_v62  ;;  %v617_v19 = vpop.permute.xlu0 %616  ;;  %v2896_v62 = vld [vmem:[%s2642_s28 + $0x84] sm:$0xff]  ;;  %v536_v3 = vshrl.u32 %v2904_v35, 16  ;;  %v541_v14 = vshll.u32 %v2934_v61, 16 }
  0xae   : > { %v1285_v18 = vshll.u32 %v976_v5, 16  ;;  %v2890_v22 = vpop.permute.xlu2 %780  ;;  %v844_v32 = vsel %vm834_vm1, %v2645_v0, %v617_v19  ;;  %v527_v6 = vshll.u32 %v2896_v62, 16  ;;  %v525_v44 = vshrl.u32 %v2896_v62, 16 }
  0xb0   : > { %v1287_v21 = vrot.slane %v1285_v18, 1  ;;  %v529_v45 = vrot.slane %v527_v6, 1 }
  0xb1   : > { %720 = vrot.lane.b32.xlu1 %v2851_v33, %s2566_s29 }
  0xb2   : > { %v1288_v25 = vsel %vm369_vm0, %v1284_v20, %v1287_v21  ;;  %v530_v31 = vor.u32 %v529_v45, %v525_v44  ;;  %v539_v20 = vshrl.u32 %v2934_v61, 16  ;;  %v543_v21 = vrot.slane %v541_v14, 1  ;;  %v220_v44 = vld [vmem:[%s2642_s28 + $0xa4] sm:$0x1] }
  0xb3   : > { %2338 = vmatmul.msk.bf16.vlgmr.msra.gmra.mxu1 %vm1049_vm4, %v1288_v25  ;;  %v693_v34 = vpop.permute.xlu1 %692  ;;  %802 = vrot.lane.b32.xlu0 %v521_v23, %s2568_s4 }
  0xb4   : > { %v913_v36 = vsel %vm903_vm3, %v844_v32, %v693_v34  ;;  %804 = vrot.lane.b32.xlu2 %v522_v27, %s2568_s4  ;;  %v535_v59 = vsel %vm369_vm0, %v530_v31, %v534_v53  ;;  %v544_v6 = vor.u32 %v543_v21, %v539_v20  ;;  %v223_v20 = vld [vmem:[%s2642_s28 + $0xb0] sm:$0x1] }
  0xb5   : > { %v775_v38 = vpop.permute.xlu0 %774 }
  0xb6   : > { %v982_v40 = vsel %vm972_vm2, %v913_v36, %v775_v38  ;;  %v2913_v41 = vpop.permute.xlu2 %626 }
  0xb7   : > { %2317 = vmatmul.msk.bf16.gmra.mxu0 %vm1049_vm4, %v2847_v30  ;;  %v1301_v0 = vshll.u32 %v982_v40, 16  ;;  %2361 = vmatmul.msk.bf16.gmra.mxu2 %vm1049_vm4, %v982_v40  ;;  %v1299_v55 = vshrl.u32 %v982_v40, 16 }
  0xb9   : > { %722 = vrot.lane.b32.xlu1 %v2864_v42, %s2566_s29  ;;  %v1303_v30 = vrot.slane %v1301_v0, 1 }
  0xbb   : > { %v695_v52 = vpop.permute.xlu1 %694  ;;  %648 = vrot.lane.b32.xlu0 %v521_v23, %s2567_s30  ;;  %v1304_v15 = vor.u32 %v1303_v30, %v1299_v55 }
  0xbc   : > { %v915_v12 = vsel %vm903_vm3, %v846_v49, %v695_v52  ;;  %650 = vrot.lane.b32.xlu2 %v522_v27, %s2567_s30  ;;  %v2972_v49 = vld [vmem:[%s2642_s28 + $0x9c] sm:$0xff] }
  0xbd   : > { %v984_v9 = vsel %vm972_vm2, %v915_v12, %v2842_v28  ;;  %v621_v50 = vpop.permute.xlu0 %620  ;;  %v322_v28 = vunpack.c.l.b16 %v217_v57  ;;  %v555_v53 = vshll.u32 %v2972_v49, 16 }
  0xbe   : > { %v1305_v56 = vshll.u32 %v984_v9, 16  ;;  %v2928_v13 = vpop.permute.xlu2 %784  ;;  %v848_v5 = vsel %vm834_vm1, %v2691_v37, %v621_v50 }
  0xbf   : > { %v2943_v10 = vpack.c.b16 %v322_v28, %v322_v28  ;;  %v854_v28 = vsel %vm834_vm1, %v2713_v51, %v2913_v41 }
  0xc0   : > { %v1307_v58 = vrot.slane %v1305_v56, 1 }
  0xc1   : > { %724 = vrot.lane.b32.xlu1 %v2896_v62, %s2566_s29  ;;  %v546_v23 = vshll.u32 %v2943_v10, 16  ;;  %v550_v30 = vshrl.u32 %v2943_v10, 16 }
  0xc2   : > { %v1308_v1 = vsel %vm369_vm0, %v1304_v15, %v1307_v58  ;;  %v553_v58 = vshrl.u32 %v2972_v49, 16  ;;  %v557_v15 = vrot.slane %v555_v53, 1 }
  0xc3   : > { %2339 = vmatmul.msk.bf16.gmra.mxu1 %vm1049_vm4, %v1298_v4  ;;  %2383 = vmatmul.msk.bf16.gmra.mxu3 %vm1049_vm4, %v1308_v1  ;;  %v697_v8 = vpop.permute.xlu1 %696  ;;  %v548_v36 = vrot.slane %v546_v23, 1 }
  0xc4   : > { %806 = vrot.lane.b32.xlu0 %v535_v59, %s2568_s4  ;;  %v917_v18 = vsel %vm903_vm3, %v848_v5, %v697_v8  ;;  %808 = vrot.lane.b32.xlu2 %v536_v3, %s2568_s4  ;;  %v558_v14 = vor.u32 %v557_v15, %v553_v58  ;;  %v226_v58 = vld [vmem:[%s2642_s28 + $0xbc] sm:$0x1] }
  0xc5   : > { %v779_v19 = vpop.permute.xlu0 %778  ;;  %v549_v46 = vsel %vm369_vm0, %v544_v6, %v548_v36 }
  0xc6   : > { %v986_v16 = vsel %vm972_vm2, %v917_v18, %v779_v19  ;;  %v2951_v4 = vpop.permute.xlu2 %630 }
  0xc7   : > { %2318 = vmatmul.msk.bf16.gmra.mxu0 %vm1049_vm4, %v982_v40  ;;  %v1311_v37 = vshll.u32 %v986_v16, 16  ;;  %2362 = vmatmul.msk.bf16.gmra.mxu2 %vm1049_vm4, %v986_v16  ;;  %v1309_v38 = vshrl.u32 %v986_v16, 16 }
  0xc9   : > { %726 = vrot.lane.b32.xlu1 %v2904_v35, %s2566_s29  ;;  %v1313_v27 = vrot.slane %v1311_v37, 1 }
  0xcb   : > { %v699_v25 = vpop.permute.xlu1 %698  ;;  %v1314_v39 = vor.u32 %v1313_v27, %v1309_v38 }
  0xcc   : > { %v919_v32 = vsel %vm903_vm3, %v850_v24, %v699_v25  ;;  %652 = vrot.lane.b32.xlu0 %v535_v59, %s2567_s30  ;;  %654 = vrot.lane.b32.xlu2 %v536_v3, %s2567_s30  ;;  %v3010_v24 = vld [vmem:[%s2642_s28 + $0xa8] sm:$0xff] }
  0xcd   : > { %v988_v34 = vsel %vm972_vm2, %v919_v32, %v2890_v22  ;;  %v625_v0 = vpop.permute.xlu0 %624  ;;  %v325_v22 = vunpack.c.l.b16 %v220_v44  ;;  %v569_v36 = vshll.u32 %v3010_v24, 16 }
  0xce   : > { %v1315_v40 = vshll.u32 %v988_v34, 16  ;;  %v2966_v54 = vpop.permute.xlu2 %788  ;;  %v852_v12 = vsel %vm834_vm1, %v2709_v48, %v625_v0 }
  0xcf   : > { %v2981_v31 = vpack.c.b16 %v325_v22, %v325_v22  ;;  %v858_v22 = vsel %vm834_vm1, %v2732_v63, %v2951_v4 }
  0xd0   : > { %v1317_v45 = vrot.slane %v1315_v40, 1 }
  0xd1   : > { %728 = vrot.lane.b32.xlu1 %v2934_v61, %s2566_s29  ;;  %v560_v59 = vshll.u32 %v2981_v31, 16  ;;  %v564_v27 = vshrl.u32 %v2981_v31, 16 }
  0xd2   : > { %v1318_v52 = vsel %vm369_vm0, %v1314_v39, %v1317_v45  ;;  %v567_v45 = vshrl.u32 %v3010_v24, 16  ;;  %v571_v39 = vrot.slane %v569_v36, 1 }
  0xd3   : > { %2340 = vmatmul.msk.bf16.gmra.mxu1 %vm1049_vm4, %v1308_v1  ;;  %2384 = vmatmul.msk.bf16.gmra.mxu3 %vm1049_vm4, %v1318_v52  ;;  %v701_v9 = vpop.permute.xlu1 %700  ;;  %v562_v18 = vrot.slane %v560_v59, 1 }
  0xd4   : > { %810 = vrot.lane.b32.xlu0 %v549_v46, %s2568_s4  ;;  %v921_v55 = vsel %vm903_vm3, %v852_v12, %v701_v9  ;;  %812 = vrot.lane.b32.xlu2 %v550_v30, %s2568_s4  ;;  %v572_v53 = vor.u32 %v571_v39, %v567_v45  ;;  %v229_v45 = vld [vmem:[%s2642_s28 + $0xc8] sm:$0x1] }
  0xd5   : > { %v783_v56 = vpop.permute.xlu0 %782  ;;  %v563_v23 = vsel %vm369_vm0, %v558_v14, %v562_v18 }
  0xd6   : > { %v990_v50 = vsel %vm972_vm2, %v921_v55, %v783_v56  ;;  %v2989_v57 = vpop.permute.xlu2 %634 }
  0xd7   : > { %2319 = vmatmul.msk.bf16.gmra.mxu0 %vm1049_vm4, %v986_v16  ;;  %v1321_v48 = vshll.u32 %v990_v50, 16  ;;  %2363 = vmatmul.msk.bf16.gmra.mxu2 %vm1049_vm4, %v990_v50  ;;  %v1319_v19 = vshrl.u32 %v990_v50, 16 }
  0xd9   : > { %730 = vrot.lane.b32.xlu1 %v2943_v10, %s2566_s29  ;;  %v1323_v3 = vrot.slane %v1321_v48, 1 }
  0xdb   : > { %v703_v1 = vpop.permute.xlu1 %702  ;;  %v1324_v51 = vor.u32 %v1323_v3, %v1319_v19 }
  0xdc   : > { %v923_v5 = vsel %vm903_vm3, %v854_v28, %v703_v1  ;;  %656 = vrot.lane.b32.xlu0 %v549_v46, %s2567_s30  ;;  %658 = vrot.lane.b32.xlu2 %v550_v30, %s2567_s30  ;;  %v3048_v28 = vld [vmem:[%s2642_s28 + $0xb4] sm:$0xff] }
  0xdd   : > { %v992_v8 = vsel %vm972_vm2, %v923_v5, %v2928_v13  ;;  %v629_v37 = vpop.permute.xlu0 %628  ;;  %v328_v13 = vunpack.c.l.b16 %v223_v20  ;;  %v583_v18 = vshll.u32 %v3048_v28, 16 }
  0xde   : > { %v1325_v16 = vshll.u32 %v992_v8, 16  ;;  %v3004_v41 = vpop.permute.xlu2 %792  ;;  %v856_v32 = vsel %vm834_vm1, %v2728_v60, %v629_v37 }
  0xdf   : > { %v3019_v6 = vpack.c.b16 %v328_v13, %v328_v13  ;;  %v862_v13 = vsel %vm834_vm1, %v2751_v17, %v2989_v57 }
  0xe0   : > { %v1327_v21 = vrot.slane %v1325_v16, 1 }
  0xe1   : > { %732 = vrot.lane.b32.xlu1 %v2972_v49, %s2566_s29  ;;  %v574_v46 = vshll.u32 %v3019_v6, 16  ;;  %v578_v3 = vshrl.u32 %v3019_v6, 16 }
  0xe2   : > { %v1328_v25 = vsel %vm369_vm0, %v1324_v51, %v1327_v21  ;;  %v581_v21 = vshrl.u32 %v3048_v28, 16  ;;  %v585_v51 = vrot.slane %v583_v18, 1 }
  0xe3   : > { %2341 = vmatmul.msk.bf16.gmra.mxu1 %vm1049_vm4, %v1318_v52  ;;  %2385 = vmatmul.msk.bf16.gmra.mxu3 %vm1049_vm4, %v1328_v25  ;;  %v705_v34 = vpop.permute.xlu1 %704  ;;  %v576_v55 = vrot.slane %v574_v46, 1 }
  0xe4   : > { %814 = vrot.lane.b32.xlu0 %v563_v23, %s2568_s4  ;;  %v925_v38 = vsel %vm903_vm3, %v856_v32, %v705_v34  ;;  %816 = vrot.lane.b32.xlu2 %v564_v27, %s2568_s4  ;;  %v586_v36 = vor.u32 %v585_v51, %v581_v21  ;;  %v232_v21 = vld [vmem:[%s2642_s28 + $0xd4] sm:$0x1] }
  0xe5   : > { %v787_v40 = vpop.permute.xlu0 %786  ;;  %v577_v59 = vsel %vm369_vm0, %v572_v53, %v576_v55 }
  0xe6   : > { %v994_v0 = vsel %vm972_vm2, %v925_v38, %v787_v40  ;;  %v3027_v44 = vpop.permute.xlu2 %638 }
  0xe7   : > { %2320 = vmatmul.msk.bf16.gmra.mxu0 %vm1049_vm4, %v990_v50  ;;  %v1331_v60 = vshll.u32 %v994_v0, 16  ;;  %2364 = vmatmul.msk.bf16.gmra.mxu2 %vm1049_vm4, %v994_v0  ;;  %v1329_v56 = vshrl.u32 %v994_v0, 16 }
  0xe9   : > { %734 = vrot.lane.b32.xlu1 %v2981_v31, %s2566_s29  ;;  %v1333_v30 = vrot.slane %v1331_v60, 1 }
  0xeb   : > { %v707_v52 = vpop.permute.xlu1 %706  ;;  %v1334_v63 = vor.u32 %v1333_v30, %v1329_v56 }
  0xec   : > { %v927_v12 = vsel %vm903_vm3, %v858_v22, %v707_v52  ;;  %660 = vrot.lane.b32.xlu0 %v563_v23, %s2567_s30  ;;  %662 = vrot.lane.b32.xlu2 %v564_v27, %s2567_s30  ;;  %v3086_v22 = vld [vmem:[%s2642_s28 + $0xc0] sm:$0xff] }
  0xed   : > { %v996_v9 = vsel %vm972_vm2, %v927_v12, %v2966_v54  ;;  %v633_v48 = vpop.permute.xlu0 %632  ;;  %v331_v54 = vunpack.c.l.b16 %v226_v58  ;;  %v597_v55 = vshll.u32 %v3086_v22, 16 }
  0xee   : > { %v1335_v50 = vshll.u32 %v996_v9, 16  ;;  %v3042_v4 = vpop.permute.xlu2 %796  ;;  %v860_v5 = vsel %vm834_vm1, %v2747_v11, %v633_v48 }
  0xef   : > { %v3057_v14 = vpack.c.b16 %v331_v54, %v331_v54  ;;  %v866_v54 = vsel %vm834_vm1, %v2770_v29, %v3027_v44 }
  0xf0   : > { %v1337_v15 = vrot.slane %v1335_v50, 1 }
  0xf1   : > { %736 = vrot.lane.b32.xlu1 %v3010_v24, %s2566_s29  ;;  %v588_v23 = vshll.u32 %v3057_v14, 16  ;;  %v592_v30 = vshrl.u32 %v3057_v14, 16 }
  0xf2   : > { %v1338_v1 = vsel %vm369_vm0, %v1334_v63, %v1337_v15  ;;  %v595_v15 = vshrl.u32 %v3086_v22, 16  ;;  %v599_v63 = vrot.slane %v597_v55, 1 }
  0xf3   : > { %2342 = vmatmul.msk.bf16.gmra.mxu1 %vm1049_vm4, %v1328_v25  ;;  %2386 = vmatmul.msk.bf16.gmra.mxu3 %vm1049_vm4, %v1338_v1  ;;  %v709_v8 = vpop.permute.xlu1 %708  ;;  %v590_v38 = vrot.slane %v588_v23, 1 }
  0xf4   : > { %818 = vrot.lane.b32.xlu0 %v577_v59, %s2568_s4  ;;  %v929_v19 = vsel %vm903_vm3, %v860_v5, %v709_v8  ;;  %820 = vrot.lane.b32.xlu2 %v578_v3, %s2568_s4  ;;  %v600_v18 = vor.u32 %v599_v63, %v595_v15 }
  0xf5   : > { %v791_v16 = vpop.permute.xlu0 %790  ;;  %v591_v46 = vsel %vm369_vm0, %v586_v36, %v590_v38 }
  0xf6   : > { %v998_v37 = vsel %vm972_vm2, %v929_v19, %v791_v16  ;;  %v3065_v20 = vpop.permute.xlu2 %642 }
  0xf7   : > { %2321 = vmatmul.msk.bf16.gmra.mxu0 %vm1049_vm4, %v994_v0  ;;  %v1341_v11 = vshll.u32 %v998_v37, 16  ;;  %2365 = vmatmul.msk.bf16.gmra.mxu2 %vm1049_vm4, %v998_v37  ;;  %v1339_v40 = vshrl.u32 %v998_v37, 16 }
  0xf9   : > { %738 = vrot.lane.b32.xlu1 %v3019_v6, %s2566_s29  ;;  %v1343_v27 = vrot.slane %v1341_v11, 1 }
  0xfb   : > { %v711_v25 = vpop.permute.xlu1 %710  ;;  %v1344_v17 = vor.u32 %v1343_v27, %v1339_v40 }
  0xfc   : > { %v931_v32 = vsel %vm903_vm3, %v862_v13, %v711_v25  ;;  %664 = vrot.lane.b32.xlu0 %v577_v59, %s2567_s30  ;;  %666 = vrot.lane.b32.xlu2 %v578_v3, %s2567_s30  ;;  %v2417_v13 = vld [vmem:[%s2642_s28 + $0xcc] sm:$0xff]  ;;  %v681_v25 = vunpack.c.l.b16 %v232_v21  ;;  %s2148_s28 = scalar_lea.hbm %s3445_s3, %s2610_s16  ;;  %s2123_s16 = scalar_lea.sflag [#allocation3], %s3373_s19 }
  0xfd   : > { %v1000_v34 = vsel %vm972_vm2, %v931_v32, %v3004_v41  ;;  %v637_v60 = vpop.permute.xlu0 %636  ;;  %v334_v41 = vunpack.c.l.b16 %v229_v45  ;;  %v755_v36 = vshll.u32 %v2417_v13, 16  ;;  %s3391_s7 = sshll.u32 %s2148_s28, 4  ;;  %s2153_s7 = int_to_ptr.hbm [resolvable:$true] %s3391_s7 }
  0xfe   : > { %v1345_v0 = vshll.u32 %v1000_v34, 16  ;;  %v3080_v57 = vpop.permute.xlu2 %800  ;;  %v864_v12 = vsel %vm834_vm1, %v2766_v26, %v637_v60  ;;  %v683_v38 = vpack.c.b16 %v681_v25, %v681_v25 }
  0xff   : > { %v3095_v53 = vpack.c.b16 %v334_v41, %v334_v41  ;;  %v870_v41 = vsel %vm834_vm1, %v2797_v47, %v3065_v20 }
 0x100   : > { %v1347_v39 = vrot.slane %v1345_v0, 1 }
 0x101   : > { %740 = vrot.lane.b32.xlu1 %v3048_v28, %s2566_s29  ;;  %v602_v59 = vshll.u32 %v3095_v53, 16  ;;  %v606_v27 = vshrl.u32 %v3095_v53, 16 }
 0x102   : > { %v1348_v52 = vsel %vm369_vm0, %v1344_v17, %v1347_v39  ;;  %v753_v39 = vshrl.u32 %v2417_v13, 16  ;;  %v757_v17 = vrot.slane %v755_v36, 1 }
 0x103   : > { %2343 = vmatmul.msk.bf16.gmra.mxu1 %vm1049_vm4, %v1338_v1  ;;  %2387 = vmatmul.msk.bf16.gmra.mxu3 %vm1049_vm4, %v1348_v52  ;;  %v713_v9 = vpop.permute.xlu1 %712  ;;  %v604_v19 = vrot.slane %v602_v59, 1 }
 0x104   : > { %822 = vrot.lane.b32.xlu0 %v591_v46, %s2568_s4  ;;  %v933_v56 = vsel %vm903_vm3, %v864_v12, %v713_v9  ;;  %824 = vrot.lane.b32.xlu2 %v592_v30, %s2568_s4  ;;  %v758_v55 = vor.u32 %v757_v17, %v753_v39 }
 0x105   : > { %v795_v50 = vpop.permute.xlu0 %794  ;;  %v605_v23 = vsel %vm369_vm0, %v600_v18, %v604_v19 }
 0x106   : > { %v1002_v48 = vsel %vm972_vm2, %v933_v56, %v795_v50  ;;  %v3103_v58 = vpop.permute.xlu2 %646 }
 0x107   : > { %2322 = vmatmul.msk.bf16.gmra.mxu0 %vm1049_vm4, %v998_v37  ;;  %v1351_v26 = vshll.u32 %v1002_v48, 16  ;;  %2366 = vmatmul.msk.bf16.gmra.mxu2 %vm1049_vm4, %v1002_v48  ;;  %v1349_v16 = vshrl.u32 %v1002_v48, 16 }
 0x109   : > { %742 = vrot.lane.b32.xlu1 %v3057_v14, %s2566_s29  ;;  %v1353_v3 = vrot.slane %v1351_v26, 1 }
 0x10b   : > { %v715_v1 = vpop.permute.xlu1 %714  ;;  %v1354_v29 = vor.u32 %v1353_v3, %v1349_v16 }
 0x10c   : > { %v935_v5 = vsel %vm903_vm3, %v866_v54, %v715_v1  ;;  %668 = vrot.lane.b32.xlu0 %v591_v46, %s2567_s30  ;;  %670 = vrot.lane.b32.xlu2 %v592_v30, %s2567_s30  ;;  %v760_v46 = vshll.u32 %v683_v38, 16  ;;  %v764_v54 = vshrl.u32 %v683_v38, 16 }
 0x10d   : > { %v1004_v8 = vsel %vm972_vm2, %v935_v5, %v3042_v4  ;;  %v641_v11 = vpop.permute.xlu0 %640 }
 0x10e   : > { %v1355_v37 = vshll.u32 %v1004_v8, 16  ;;  %v3118_v44 = vpop.permute.xlu2 %804  ;;  %v868_v32 = vsel %vm834_vm1, %v2790_v43, %v641_v11  ;;  %v762_v56 = vrot.slane %v760_v46, 1 }
 0x110   : > { %v1357_v51 = vrot.slane %v1355_v37, 1  ;;  %v763_v47 = vsel %vm369_vm0, %v758_v55, %v762_v56  ;;  %v874_v37 = vsel %vm834_vm1, %v2826_v7, %v3103_v58 }
 0x111   : > { %744 = vrot.lane.b32.xlu1 %v3086_v22, %s2566_s29 }
 0x112   : > { %v1358_v4 = vsel %vm369_vm0, %v1354_v29, %v1357_v51 }
 0x113   : > { %2344 = vmatmul.msk.bf16.gmra.mxu1 %vm1049_vm4, %v1348_v52  ;;  %2388 = vmatmul.msk.bf16.gmra.mxu3 %vm1049_vm4, %v1358_v4  ;;  %v717_v34 = vpop.permute.xlu1 %716 }
 0x114   : > { %826 = vrot.lane.b32.xlu0 %v605_v23, %s2568_s4  ;;  %v937_v40 = vsel %vm903_vm3, %v868_v32, %v717_v34  ;;  %828 = vrot.lane.b32.xlu2 %v606_v27, %s2568_s4 }
 0x115   : > { %v799_v0 = vpop.permute.xlu0 %798 }
 0x116   : > { %v1006_v60 = vsel %vm972_vm2, %v937_v40, %v799_v0  ;;  %v3136_v43 = vpop.permute.xlu2 %650 }
 0x117   : > { %2323 = vmatmul.msk.bf16.gmra.mxu0 %vm1049_vm4, %v1002_v48  ;;  %v1361_v45 = vshll.u32 %v1006_v60, 16  ;;  %2367 = vmatmul.msk.bf16.gmra.mxu2 %vm1049_vm4, %v1006_v60  ;;  %v1359_v50 = vshrl.u32 %v1006_v60, 16 }
 0x119   : > { %746 = vrot.lane.b32.xlu1 %v3095_v53, %s2566_s29  ;;  %v1363_v30 = vrot.slane %v1361_v45, 1 }
 0x11b   : > { %v719_v52 = vpop.permute.xlu1 %718  ;;  %v1364_v63 = vor.u32 %v1363_v30, %v1359_v50 }
 0x11c   : > { %v939_v12 = vsel %vm903_vm3, %v870_v41, %v719_v52  ;;  %672 = vrot.lane.b32.xlu0 %v605_v23, %s2567_s30  ;;  %674 = vrot.lane.b32.xlu2 %v606_v27, %s2567_s30 }
 0x11d   : > { %v1008_v9 = vsel %vm972_vm2, %v939_v12, %v3080_v57  ;;  %v645_v26 = vpop.permute.xlu0 %644 }
 0x11e   : > { %v1365_v48 = vshll.u32 %v1008_v9, 16  ;;  %v3148_v59 = vpop.permute.xlu2 %808  ;;  %v872_v57 = vsel %vm834_vm1, %v2822_v2, %v645_v26 }
 0x120   : > { %v1367_v15 = vrot.slane %v1365_v48, 1 }
 0x121   : > { %748 = vrot.lane.b32.xlu1 %v2417_v13, %s2566_s29 }
 0x122   : > { %v1368_v20 = vsel %vm369_vm0, %v1364_v63, %v1367_v15 }
 0x123   : > { %2345 = vmatmul.msk.bf16.gmra.mxu1 %vm1049_vm4, %v1358_v4  ;;  %2389 = vmatmul.msk.bf16.gmra.mxu3 %vm1049_vm4, %v1368_v20  ;;  %v721_v1 = vpop.permute.xlu1 %720 }
 0x124   : > { %v1091_v3 = vpop.f32.mrf.mxu0  ;;  %830 = vrot.lane.b32.xlu0 %v763_v47, %s2568_s4  ;;  %v1713_v5 = vpop.f32.mrf.mxu2  ;;  %v941_v8 = vsel %vm903_vm3, %v872_v57, %v721_v1  ;;  %832 = vrot.lane.b32.xlu2 %v764_v54, %s2568_s4  ;;  %s3386_s4 = sshll.u32 %s2135_s25, 4  ;;  %s2140_s4 = int_to_ptr.hbm [resolvable:$true] %s3386_s4 }
 0x125   : > { %v803_v18 = vpop.permute.xlu0 %802  ;;  %v1209_v21 = vmul.f32 %v1091_v3, %v1091_v3  ;;  %v1831_v13 = vmul.f32 %v1713_v5, %v1713_v5  ;;  %s2484_s8 = sshra.s32 %s2140_s4, 4  ;;  %s2485_s8 = int_to_ptr.hbm [resolvable:$true] %s2484_s8 }
 0x126   : > { %v1010_v19 = vsel %vm972_vm2, %v941_v8, %v803_v18  ;;  %v3163_v2 = vpop.permute.xlu2 %654  ;;  %s2486_s9 = scalar_lea.hbm %s2485_s8, 1  ;;  %p2491_p0 = scmp.lt.s32.totalorder %s2485_s8, %s3444_s2 }
 0x127   : > { %2324 = vmatmul.msk.bf16.gmra.mxu0 %vm1049_vm4, %v1006_v60  ;;  %v1371_v16 = vshll.u32 %v1010_v19, 16  ;;  %2368 = vmatmul.msk.bf16.gmra.mxu2 %vm1049_vm4, %v1010_v19  ;;  %v1369_v34 = vshrl.u32 %v1010_v19, 16  ;;  %p2487_p11 = scmp.ne.s32.totalorder %s2485_s8, %s2486_s9  ;;  %p2492_p1 = scmp.lt.s32.totalorder %s2490_s17, %s2486_s9 }
 0x129   : > { %750 = vrot.lane.b32.xlu1 %v683_v38, %s2566_s29  ;;  %v1373_v51 = vrot.slane %v1371_v16, 1  ;;  %s166_s29 = scalar_lea.vmem [#allocation2], %s3373_s19  ;;  %p2488_p12 = pnand %p2487_p11, %p2627_p5 }
 0x12a   : > { %s3384_s30 = sshll.u32 %s166_s29, 4  ;;  %p2493_p2 = por %p2492_p1, %p2491_p0  ;;  %s2138_s30 = int_to_ptr.vmem [resolvable:$true] %s3384_s30 }
 0x12b   : > { %v723_v11 = vpop.permute.xlu1 %722  ;;  %v1374_v17 = vor.u32 %v1373_v51, %v1369_v34  ;;  %p2489_p13 = pneg %p2488_p12 }
 0x12c   : > { %v943_v29 = vsel %vm903_vm3, %v874_v37, %v723_v11  ;;  %v1093_v23 = vpop.f32.mrf.mxu0  ;;  %v1715_v32 = vpop.f32.mrf.mxu2 }
 0x12d   : > { %v1012_v25 = vsel %vm972_vm2, %v943_v29, %v3118_v44  ;;  %v1171_v4 = vadd.f32 %v1093_v23, %v1091_v3  ;;  %v1210_v27 = vmul.f32 %v1093_v23, %v1093_v23  ;;  %v1793_v38 = vadd.f32 %v1715_v32, %v1713_v5  ;;  %v649_v0 = vpop.permute.xlu0 %648  ;;  %p2494_p3 = pnand %p2493_p2, %p2489_p13 }
 0x12e   : > { %v1375_v36 = vshll.u32 %v1012_v25, 16  ;;  %v1832_v40 = vmul.f32 %v1715_v32, %v1715_v32  ;;  %v3172_v46 = vpop.permute.xlu2 %812  ;;  %v876_v44 = vsel %vm834_vm1, %v2851_v33, %v649_v0  ;;  %v878_v5 = vsel %vm834_vm1, %v2864_v42, %v3136_v43 }
 0x12f   : > { %v1241_v60 = vadd.f32 %v1210_v27, %v1209_v21  ;;  %v1932_v39 = vpop.f32.mrf.mxu3 }
 0x130   : > { %v1377_v7 = vrot.slane %v1375_v36, 1  ;;  %v1863_v58 = vadd.f32 %v1832_v40, %v1831_v13  ;;  %v1505_v45 = vpop.f32.mrf.mxu1  ;;  %v2050_v15 = vmul.f32 %v1932_v39, %v1932_v39 }
 0x131   : > { %v1623_v26 = vmul.f32 %v1505_v45, %v1505_v45 }
 0x132   : > { %v1378_v41 = vsel %vm369_vm0, %v1374_v17, %v1377_v7 }
 0x133   : > { %2346 = vmatmul.msk.bf16.gmra.mxu1 %vm1049_vm4, %v1368_v20  ;;  %2390 = vmatmul.msk.bf16.gmra.mxu3 %vm1049_vm4, %v1378_v41  ;;  %v725_v52 = vpop.permute.xlu1 %724 }
 0x134   : > { %v1096_v30 = vpop.f32.mrf.mxu0  ;;  %v945_v55 = vsel %vm903_vm3, %v876_v44, %v725_v52 }
 0x135   : > { %v1172_v12 = vadd.f32 %v1171_v4, %v1096_v30  ;;  %v1211_v9 = vmul.f32 %v1096_v30, %v1096_v30 }
 0x136   : > { %v807_v56 = vpop.permute.xlu0 %806  ;;  %v3183_v3 = vpop.permute.xlu2 %658 }
 0x137   : > { %v1242_v50 = vadd.f32 %v1241_v60, %v1211_v9  ;;  %v1014_v48 = vsel %vm972_vm2, %v945_v55, %v807_v56  ;;  %2325 = vmatmul.msk.bf16.gmra.mxu0 %vm1049_vm4, %v1010_v19  ;;  %v1934_v47 = vpop.f32.mrf.mxu3 }
 0x138   : > { %v1381_v63 = vshll.u32 %v1014_v48, 16  ;;  %v1507_v33 = vpop.f32.mrf.mxu1  ;;  %2369 = vmatmul.msk.bf16.gmra.mxu2 %vm1049_vm4, %v1014_v48  ;;  %v2012_v57 = vadd.f32 %v1934_v47, %v1932_v39  ;;  %v2051_v1 = vmul.f32 %v1934_v47, %v1934_v47  ;;  %v1379_v4 = vshrl.u32 %v1014_v48, 16 }
 0x139   : > { %v1585_v20 = vadd.f32 %v1507_v33, %v1505_v45  ;;  %v1624_v54 = vmul.f32 %v1507_v33, %v1507_v33 }
 0x13a   : > { %v2082_v18 = vadd.f32 %v2051_v1, %v2050_v15  ;;  %v1718_v16 = vpop.f32.mrf.mxu2  ;;  %v1383_v37 = vrot.slane %v1381_v63, 1  ;;  %v882_v1 = vsel %vm834_vm1, %v2904_v35, %v3163_v2 }
 0x13b   : > { %v1655_v8 = vadd.f32 %v1624_v54, %v1623_v26  ;;  %v727_v19 = vpop.permute.xlu1 %726  ;;  %v1794_v51 = vadd.f32 %v1793_v38, %v1718_v16  ;;  %v1833_v29 = vmul.f32 %v1718_v16, %v1718_v16 }
 0x13c   : > { %v947_v11 = vsel %vm903_vm3, %v878_v5, %v727_v19  ;;  %v1098_v21 = vpop.f32.mrf.mxu0  ;;  %v1384_v40 = vor.u32 %v1383_v37, %v1379_v4 }
 0x13d   : > { %v1016_v23 = vsel %vm972_vm2, %v947_v11, %v3148_v59  ;;  %v1173_v13 = vadd.f32 %v1172_v12, %v1098_v21  ;;  %v1212_v25 = vmul.f32 %v1098_v21, %v1098_v21  ;;  %v1864_v32 = vadd.f32 %v1863_v58, %v1833_v29 }
 0x13e   : > { %v1385_v27 = vshll.u32 %v1016_v23, 16  ;;  %v653_v34 = vpop.permute.xlu0 %652  ;;  %v3196_v12 = vpop.permute.xlu2 %816 }
 0x13f   : > { %v1243_v42 = vadd.f32 %v1242_v50, %v1212_v25  ;;  %v880_v38 = vsel %vm834_vm1, %v2896_v62, %v653_v34 }
 0x140   : > { %v1387_v43 = vrot.slane %v1385_v27, 1  ;;  %v1510_v36 = vpop.f32.mrf.mxu1 }
 0x141   : > { %v1586_v0 = vadd.f32 %v1585_v20, %v1510_v36  ;;  %v1625_v60 = vmul.f32 %v1510_v36, %v1510_v36 }
 0x142   : > { %v1388_v7 = vsel %vm369_vm0, %v1384_v40, %v1387_v43  ;;  %v1720_v39 = vpop.f32.mrf.mxu2 }
 0x143   : > { %v1656_v45 = vadd.f32 %v1655_v8, %v1625_v60  ;;  %2347 = vmatmul.msk.bf16.gmra.mxu1 %vm1049_vm4, %v1378_v41  ;;  %2391 = vmatmul.msk.bf16.gmra.mxu3 %vm1049_vm4, %v1388_v7  ;;  %v729_v59 = vpop.permute.xlu1 %728  ;;  %v1795_v17 = vadd.f32 %v1794_v51, %v1720_v39  ;;  %v1834_v44 = vmul.f32 %v1720_v39, %v1720_v39 }
 0x144   : > { %v1101_v58 = vpop.f32.mrf.mxu0  ;;  %v949_v9 = vsel %vm903_vm3, %v880_v38, %v729_v59 }
 0x145   : > { %v1174_v52 = vadd.f32 %v1173_v13, %v1101_v58  ;;  %v1213_v30 = vmul.f32 %v1101_v58, %v1101_v58  ;;  %v1865_v55 = vadd.f32 %v1864_v32, %v1834_v44 }
 0x146   : > { %v1937_v56 = vpop.f32.mrf.mxu3  ;;  %v811_v50 = vpop.permute.xlu0 %810 }
 0x147   : > { %v1244_v62 = vadd.f32 %v1243_v42, %v1213_v30  ;;  %v2013_v26 = vadd.f32 %v2012_v57, %v1937_v56  ;;  %v2052_v15 = vmul.f32 %v1937_v56, %v1937_v56  ;;  %v1018_v41 = vsel %vm972_vm2, %v949_v9, %v811_v50  ;;  %2326 = vmatmul.msk.bf16.gmra.mxu0 %vm1049_vm4, %v1014_v48  ;;  %v3208_v43 = vpop.permute.xlu2 %662 }
 0x148   : > { %v1391_v63 = vshll.u32 %v1018_v41, 16  ;;  %v1512_v33 = vpop.f32.mrf.mxu1  ;;  %2370 = vmatmul.msk.bf16.gmra.mxu2 %vm1049_vm4, %v1018_v41  ;;  %v1389_v29 = vshrl.u32 %v1018_v41, 16 }
 0x149   : > { %v2083_v47 = vadd.f32 %v2082_v18, %v2052_v15  ;;  %v1587_v20 = vadd.f32 %v1586_v0, %v1512_v33  ;;  %v1626_v54 = vmul.f32 %v1512_v33, %v1512_v33 }
 0x14a   : > { %v1723_v19 = vpop.f32.mrf.mxu2  ;;  %v1393_v57 = vrot.slane %v1391_v63, 1 }
 0x14b   : > { %v1657_v5 = vadd.f32 %v1656_v45, %v1626_v54  ;;  %v731_v8 = vpop.permute.xlu1 %730  ;;  %v1796_v11 = vadd.f32 %v1795_v17, %v1723_v19  ;;  %v1835_v48 = vmul.f32 %v1723_v19, %v1723_v19  ;;  %v886_v54 = vsel %vm834_vm1, %v2943_v10, %v3183_v3 }
 0x14c   : > { %v951_v16 = vsel %vm903_vm3, %v882_v1, %v731_v8  ;;  %v1103_v37 = vpop.f32.mrf.mxu0  ;;  %v1394_v42 = vor.u32 %v1393_v57, %v1389_v29 }
 0x14d   : > { %v1020_v21 = vsel %vm972_vm2, %v951_v16, %v3172_v46  ;;  %v1175_v51 = vadd.f32 %v1174_v52, %v1103_v37  ;;  %v1214_v18 = vmul.f32 %v1103_v37, %v1103_v37  ;;  %v1866_v13 = vadd.f32 %v1865_v55, %v1835_v48 }
 0x14e   : > { %v1395_v23 = vshll.u32 %v1020_v21, 16  ;;  %v1939_v25 = vpop.f32.mrf.mxu3  ;;  %v657_v4 = vpop.permute.xlu0 %656 }
 0x14f   : > { %v1245_v35 = vadd.f32 %v1244_v62, %v1214_v18  ;;  %v2014_v2 = vadd.f32 %v2013_v26, %v1939_v25  ;;  %v2053_v27 = vmul.f32 %v1939_v25, %v1939_v25  ;;  %v884_v60 = vsel %vm834_vm1, %v2934_v61, %v657_v4 }
 0x150   : > { %v1397_v32 = vrot.slane %v1395_v23, 1  ;;  %v1515_v34 = vpop.f32.mrf.mxu1 }
 0x151   : > { %v2084_v36 = vadd.f32 %v2083_v47, %v2053_v27  ;;  %v1588_v40 = vadd.f32 %v1587_v20, %v1515_v34  ;;  %v1627_v0 = vmul.f32 %v1515_v34, %v1515_v34  ;;  %v3219_v20 = vpop.permute.xlu2 %820 }
 0x152   : > { %v1398_v46 = vsel %vm369_vm0, %v1394_v42, %v1397_v32  ;;  %v1725_v59 = vpop.f32.mrf.mxu2 }
 0x153   : > { %v1658_v38 = vadd.f32 %v1657_v5, %v1627_v0  ;;  %2348 = vmatmul.msk.bf16.gmra.mxu1 %vm1049_vm4, %v1388_v7  ;;  %2392 = vmatmul.msk.bf16.gmra.mxu3 %vm1049_vm4, %v1398_v46  ;;  %v733_v45 = vpop.permute.xlu1 %732  ;;  %v1797_v58 = vadd.f32 %v1796_v11, %v1725_v59  ;;  %v1836_v17 = vmul.f32 %v1725_v59, %v1725_v59 }
 0x154   : > { %v1106_v39 = vpop.f32.mrf.mxu0  ;;  %v953_v30 = vsel %vm903_vm3, %v884_v60, %v733_v45 }
 0x155   : > { %v1176_v44 = vadd.f32 %v1175_v51, %v1106_v39  ;;  %v1215_v52 = vmul.f32 %v1106_v39, %v1106_v39  ;;  %v1867_v9 = vadd.f32 %v1866_v13, %v1836_v17 }
 0x156   : > { %v1942_v55 = vpop.f32.mrf.mxu3  ;;  %v815_v56 = vpop.permute.xlu0 %814 }
 0x157   : > { %v1246_v50 = vadd.f32 %v1245_v35, %v1215_v52  ;;  %v2015_v62 = vadd.f32 %v2014_v2, %v1942_v55  ;;  %v2054_v61 = vmul.f32 %v1942_v55, %v1942_v55  ;;  %v1022_v26 = vsel %vm972_vm2, %v953_v30, %v815_v56  ;;  %2327 = vmatmul.msk.bf16.gmra.mxu0 %vm1049_vm4, %v1018_v41 }
 0x158   : > { %v1401_v7 = vshll.u32 %v1022_v26, 16  ;;  %v1517_v15 = vpop.f32.mrf.mxu1  ;;  %2371 = vmatmul.msk.bf16.gmra.mxu2 %vm1049_vm4, %v1022_v26  ;;  %v1399_v51 = vshrl.u32 %v1022_v26, 16 }
 0x159   : > { %v2085_v63 = vadd.f32 %v2084_v36, %v2054_v61  ;;  %v1589_v33 = vadd.f32 %v1588_v40, %v1517_v15  ;;  %v1628_v47 = vmul.f32 %v1517_v15, %v1517_v15  ;;  %v890_v15 = vsel %vm834_vm1, %v2981_v31, %v3208_v43 }
 0x15a   : > { %v1728_v8 = vpop.f32.mrf.mxu2  ;;  %v1403_v19 = vrot.slane %v1401_v7, 1 }
 0x15b   : > { %v1659_v1 = vadd.f32 %v1658_v38, %v1628_v47  ;;  %v735_v5 = vpop.permute.xlu1 %734  ;;  %v1798_v16 = vadd.f32 %v1797_v58, %v1728_v8  ;;  %v1837_v37 = vmul.f32 %v1728_v8, %v1728_v8  ;;  %v3232_v58 = vpop.permute.xlu2 %666 }
 0x15c   : > { %v955_v57 = vsel %vm903_vm3, %v886_v54, %v735_v5  ;;  %v1108_v41 = vpop.f32.mrf.mxu0  ;;  %v1404_v2 = vor.u32 %v1403_v19, %v1399_v51 }
 0x15d   : > { %v1024_v11 = vsel %vm972_vm2, %v955_v57, %v3196_v12  ;;  %v1177_v48 = vadd.f32 %v1176_v44, %v1108_v41  ;;  %v1216_v21 = vmul.f32 %v1108_v41, %v1108_v41  ;;  %v1868_v29 = vadd.f32 %v1867_v9, %v1837_v37 }
 0x15e   : > { %v1405_v18 = vshll.u32 %v1024_v11, 16  ;;  %v1944_v23 = vpop.f32.mrf.mxu3  ;;  %v661_v13 = vpop.permute.xlu0 %660 }
 0x15f   : > { %v1247_v10 = vadd.f32 %v1246_v50, %v1216_v21  ;;  %v2016_v3 = vadd.f32 %v2015_v62, %v1944_v23  ;;  %v2055_v25 = vmul.f32 %v1944_v23, %v1944_v23  ;;  %v888_v12 = vsel %vm834_vm1, %v2972_v49, %v661_v13 }
 0x160   : > { %v1407_v4 = vrot.slane %v1405_v18, 1  ;;  %v1520_v35 = vpop.f32.mrf.mxu1 }
 0x161   : > { %v2086_v27 = vadd.f32 %v2085_v63, %v2055_v25  ;;  %v1590_v32 = vadd.f32 %v1589_v33, %v1520_v35  ;;  %v1629_v34 = vmul.f32 %v1520_v35, %v1520_v35 }
 0x162   : > { %v1408_v42 = vsel %vm369_vm0, %v1404_v2, %v1407_v4  ;;  %v1730_v0 = vpop.f32.mrf.mxu2 }
 0x163   : > { %v1660_v36 = vadd.f32 %v1659_v1, %v1629_v34  ;;  %2349 = vmatmul.msk.bf16.gmra.mxu1 %vm1049_vm4, %v1398_v46  ;;  %2393 = vmatmul.msk.bf16.gmra.mxu3 %vm1049_vm4, %v1408_v42  ;;  %v737_v40 = vpop.permute.xlu1 %736  ;;  %v1799_v38 = vadd.f32 %v1798_v16, %v1730_v0  ;;  %v1838_v45 = vmul.f32 %v1730_v0, %v1730_v0  ;;  %v825_v13 = vpop.permute.xlu2 %824 }
 0x164   : > { %v1111_v60 = vpop.f32.mrf.mxu0  ;;  %v957_v17 = vsel %vm903_vm3, %v888_v12, %v737_v40 }
 0x165   : > { %v1178_v59 = vadd.f32 %v1177_v48, %v1111_v60  ;;  %v1217_v39 = vmul.f32 %v1111_v60, %v1111_v60  ;;  %v1869_v44 = vadd.f32 %v1868_v29, %v1838_v45 }
 0x166   : > { %v1947_v52 = vpop.f32.mrf.mxu3  ;;  %v819_v30 = vpop.permute.xlu0 %818 }
 0x167   : > { %v1248_v49 = vadd.f32 %v1247_v10, %v1217_v39  ;;  %v2017_v9 = vadd.f32 %v2016_v3, %v1947_v52  ;;  %v2056_v55 = vmul.f32 %v1947_v52, %v1947_v52  ;;  %v1026_v46 = vsel %vm972_vm2, %v957_v17, %v819_v30  ;;  %2328 = vmatmul.msk.bf16.gmra.mxu0 %vm1049_vm4, %v1022_v26 }
 0x168   : > { %v1411_v56 = vshll.u32 %v1026_v46, 16  ;;  %v1522_v50 = vpop.f32.mrf.mxu1  ;;  %2372 = vmatmul.msk.bf16.gmra.mxu2 %vm1049_vm4, %v1026_v46  ;;  %v1409_v16 = vshrl.u32 %v1026_v46, 16 }
 0x169   : > { %v2087_v62 = vadd.f32 %v2086_v27, %v2056_v55  ;;  %v1591_v61 = vadd.f32 %v1590_v32, %v1522_v50  ;;  %v1630_v7 = vmul.f32 %v1522_v50, %v1522_v50  ;;  %v894_v55 = vsel %vm834_vm1, %v3019_v6, %v3232_v58 }
 0x16a   : > { %v1733_v47 = vpop.f32.mrf.mxu2  ;;  %v1413_v54 = vrot.slane %v1411_v56, 1 }
 0x16b   : > { %v1661_v63 = vadd.f32 %v1660_v36, %v1630_v7  ;;  %v739_v33 = vpop.permute.xlu1 %738  ;;  %v1800_v8 = vadd.f32 %v1799_v38, %v1733_v47  ;;  %v1839_v26 = vmul.f32 %v1733_v47, %v1733_v47 }
 0x16c   : > { %v959_v1 = vsel %vm903_vm3, %v890_v15, %v739_v33  ;;  %v1113_v5 = vpop.f32.mrf.mxu0  ;;  %v1414_v18 = vor.u32 %v1413_v54, %v1409_v16 }
 0x16d   : > { %v1028_v19 = vsel %vm972_vm2, %v959_v1, %v3219_v20  ;;  %v1179_v57 = vadd.f32 %v1178_v59, %v1113_v5  ;;  %v1218_v41 = vmul.f32 %v1113_v5, %v1113_v5  ;;  %v1870_v11 = vadd.f32 %v1869_v44, %v1839_v26 }
 0x16e   : > { %v1415_v37 = vshll.u32 %v1028_v19, 16  ;;  %v1949_v48 = vpop.f32.mrf.mxu3  ;;  %v665_v21 = vpop.permute.xlu0 %664 }
 0x16f   : > { %v1249_v31 = vadd.f32 %v1248_v49, %v1218_v41  ;;  %v2018_v43 = vadd.f32 %v2017_v9, %v1949_v48  ;;  %v2057_v51 = vmul.f32 %v1949_v48, %v1949_v48  ;;  %v892_v20 = vsel %vm834_vm1, %v3010_v24, %v665_v21  ;;  %v671_v9 = vpop.permute.xlu2 %670 }
 0x170   : > { %v1417_v29 = vrot.slane %v1415_v37, 1  ;;  %v1525_v23 = vpop.f32.mrf.mxu1 }
 0x171   : > { %v2088_v10 = vadd.f32 %v2087_v62, %v2057_v51  ;;  %v1592_v3 = vadd.f32 %v1591_v61, %v1525_v23  ;;  %v1631_v25 = vmul.f32 %v1525_v23, %v1525_v23 }
 0x172   : > { %v1418_v4 = vsel %vm369_vm0, %v1414_v18, %v1417_v29  ;;  %v1735_v27 = vpop.f32.mrf.mxu2 }
 0x173   : > { %v1662_v35 = vadd.f32 %v1661_v63, %v1631_v25  ;;  %2350 = vmatmul.msk.bf16.gmra.mxu1 %vm1049_vm4, %v1408_v42  ;;  %2394 = vmatmul.msk.bf16.gmra.mxu3 %vm1049_vm4, %v1418_v4  ;;  %v741_v2 = vpop.permute.xlu1 %740  ;;  %v1801_v34 = vadd.f32 %v1800_v8, %v1735_v27  ;;  %v1840_v12 = vmul.f32 %v1735_v27, %v1735_v27 }
 0x174   : > { %v1116_v32 = vpop.f32.mrf.mxu0  ;;  %v961_v0 = vsel %vm903_vm3, %v892_v20, %v741_v2 }
 0x175   : > { %v1180_v36 = vadd.f32 %v1179_v57, %v1116_v32  ;;  %v1219_v40 = vmul.f32 %v1116_v32, %v1116_v32  ;;  %v1871_v60 = vadd.f32 %v1870_v11, %v1840_v12 }
 0x176   : > { %v1952_v38 = vpop.f32.mrf.mxu3  ;;  %v823_v45 = vpop.permute.xlu0 %822 }
 0x177   : > { %v1250_v59 = vadd.f32 %v1249_v31, %v1219_v40  ;;  %v2019_v39 = vadd.f32 %v2018_v43, %v1952_v38  ;;  %v2058_v24 = vmul.f32 %v1952_v38, %v1952_v38  ;;  %v1030_v17 = vsel %vm972_vm2, %v961_v0, %v823_v45  ;;  %2329 = vmatmul.msk.bf16.gmra.mxu0 %vm1049_vm4, %v1026_v46  ;;  %v829_v20 = vpop.permute.xlu2 %828 }
 0x178   : > { %v1421_v42 = vshll.u32 %v1030_v17, 16  ;;  %v1527_v44 = vpop.f32.mrf.mxu1  ;;  %2373 = vmatmul.msk.bf16.gmra.mxu2 %vm1049_vm4, %v1030_v17  ;;  %v1419_v1 = vshrl.u32 %v1030_v17, 16  ;;  %v898_v45 = vsel %vm834_vm1, %v3057_v14, %v671_v9 }
 0x179   : > { %v2089_v52 = vadd.f32 %v2088_v10, %v2058_v24  ;;  %v1593_v30 = vadd.f32 %v1592_v3, %v1527_v44  ;;  %v1632_v49 = vmul.f32 %v1527_v44, %v1527_v44 }
 0x17a   : > { %v1738_v62 = vpop.f32.mrf.mxu2  ;;  %v1423_v61 = vrot.slane %v1421_v42, 1 }
 0x17b   : > { %v1663_v56 = vadd.f32 %v1662_v35, %v1632_v49  ;;  %v743_v50 = vpop.permute.xlu1 %742  ;;  %v1802_v46 = vadd.f32 %v1801_v34, %v1738_v62  ;;  %v1841_v63 = vmul.f32 %v1738_v62, %v1738_v62 }
 0x17c   : > { %v963_v7 = vsel %vm903_vm3, %v894_v55, %v743_v50  ;;  %v1118_v15 = vpop.f32.mrf.mxu0  ;;  %v1424_v41 = vor.u32 %v1423_v61, %v1419_v1 }
 0x17d   : > { %v1032_v33 = vsel %vm972_vm2, %v963_v7, %v825_v13  ;;  %v1181_v47 = vadd.f32 %v1180_v36, %v1118_v15  ;;  %v1220_v54 = vmul.f32 %v1118_v15, %v1118_v15  ;;  %v1872_v8 = vadd.f32 %v1871_v60, %v1841_v63 }
 0x17e   : > { %v1425_v5 = vshll.u32 %v1032_v33, 16  ;;  %v1954_v26 = vpop.f32.mrf.mxu3  ;;  %v669_v19 = vpop.permute.xlu0 %668 }
 0x17f   : > { %v1251_v57 = vadd.f32 %v1250_v59, %v1220_v54  ;;  %v2020_v6 = vadd.f32 %v2019_v39, %v1954_v26  ;;  %v2059_v58 = vmul.f32 %v1954_v26, %v1954_v26  ;;  %v896_v43 = vsel %vm834_vm1, %v3048_v28, %v669_v19  ;;  %v675_v54 = vpop.permute.xlu2 %674 }
 0x180   : > { %v1427_v16 = vrot.slane %v1425_v5, 1  ;;  %v1530_v37 = vpop.f32.mrf.mxu1 }
 0x181   : > { %v2090_v11 = vadd.f32 %v2089_v52, %v2059_v58  ;;  %v1594_v48 = vadd.f32 %v1593_v30, %v1530_v37  ;;  %v1633_v21 = vmul.f32 %v1530_v37, %v1530_v37 }
 0x182   : > { %v1428_v31 = vsel %vm369_vm0, %v1424_v41, %v1427_v16  ;;  %v1740_v29 = vpop.f32.mrf.mxu2 }
 0x183   : > { %v1664_v51 = vadd.f32 %v1663_v56, %v1633_v21  ;;  %2351 = vmatmul.msk.bf16.gmra.mxu1 %vm1049_vm4, %v1418_v4  ;;  %2395 = vmatmul.msk.bf16.gmra.mxu3 %vm1049_vm4, %v1428_v31  ;;  %v745_v18 = vpop.permute.xlu1 %744  ;;  %v1803_v13 = vadd.f32 %v1802_v46, %v1740_v29  ;;  %v1842_v10 = vmul.f32 %v1740_v29, %v1740_v29 }
 0x184   : > { %v1121_v23 = vpop.f32.mrf.mxu0  ;;  %v965_v35 = vsel %vm903_vm3, %v896_v43, %v745_v18 }
 0x185   : > { %v1182_v3 = vadd.f32 %v1181_v47, %v1121_v23  ;;  %v1221_v25 = vmul.f32 %v1121_v23, %v1121_v23  ;;  %v1873_v2 = vadd.f32 %v1872_v8, %v1842_v10 }
 0x186   : > { %v1957_v27 = vpop.f32.mrf.mxu3  ;;  %v827_v32 = vpop.permute.xlu0 %826 }
 0x187   : > { %v1252_v34 = vadd.f32 %v1251_v57, %v1221_v25  ;;  %v2021_v28 = vadd.f32 %v2020_v6, %v1957_v27  ;;  %v2060_v12 = vmul.f32 %v1957_v27, %v1957_v27  ;;  %v1034_v4 = vsel %vm972_vm2, %v965_v35, %v827_v32  ;;  %2330 = vmatmul.msk.bf16.gmra.mxu0 %vm1049_vm4, %v1030_v17  ;;  %v833_v35 = vpop.permute.xlu2 %832 }
 0x188   : > { %v1431_v36 = vshll.u32 %v1034_v4, 16  ;;  %v1532_v40 = vpop.f32.mrf.mxu1  ;;  %2374 = vmatmul.msk.bf16.gmra.mxu2 %vm1049_vm4, %v1034_v4  ;;  %v1429_v50 = vshrl.u32 %v1034_v4, 16 }
 0x189   : > { %v2091_v0 = vadd.f32 %v2090_v11, %v2060_v12  ;;  %v1595_v60 = vadd.f32 %v1594_v48, %v1532_v40  ;;  %v1634_v38 = vmul.f32 %v1532_v40, %v1532_v40 }
 0x18a   : > { %v1743_v24 = vpop.f32.mrf.mxu2  ;;  %v1433_v42 = vrot.slane %v1431_v36, 1 }
 0x18b   : > { %v1665_v59 = vadd.f32 %v1664_v51, %v1634_v38  ;;  %v747_v39 = vpop.permute.xlu1 %746  ;;  %v1804_v30 = vadd.f32 %v1803_v13, %v1743_v24  ;;  %v1843_v49 = vmul.f32 %v1743_v24, %v1743_v24 }
 0x18c   : > { %v967_v44 = vsel %vm903_vm3, %v898_v45, %v747_v39  ;;  %v1123_v52 = vpop.f32.mrf.mxu0  ;;  %v1434_v63 = vor.u32 %v1433_v42, %v1429_v50 }
 0x18d   : > { %v1036_v17 = vsel %vm972_vm2, %v967_v44, %v829_v20  ;;  %v1183_v55 = vadd.f32 %v1182_v3, %v1123_v52  ;;  %v1222_v56 = vmul.f32 %v1123_v52, %v1123_v52  ;;  %v1874_v61 = vadd.f32 %v1873_v2, %v1843_v49 }
 0x18e   : > { %v1435_v62 = vshll.u32 %v1036_v17, 16  ;;  %v1959_v7 = vpop.f32.mrf.mxu3  ;;  %v673_v15 = vpop.permute.xlu0 %672  ;;  %v902_v2 = vsel %vm834_vm1, %v3095_v53, %v675_v54 }
 0x18f   : > { %v1253_v46 = vadd.f32 %v1252_v34, %v1222_v56  ;;  %v2022_v14 = vadd.f32 %v2021_v28, %v1959_v7  ;;  %v2061_v9 = vmul.f32 %v1959_v7, %v1959_v7  ;;  %v900_v19 = vsel %vm834_vm1, %v3086_v22, %v673_v15 }
 0x190   : > { %v1437_v33 = vrot.slane %v1435_v62, 1  ;;  %v1535_v47 = vpop.f32.mrf.mxu1 }
 0x191   : > { %v2092_v1 = vadd.f32 %v2091_v0, %v2061_v9  ;;  %v1596_v5 = vadd.f32 %v1595_v60, %v1535_v47  ;;  %v1635_v8 = vmul.f32 %v1535_v47, %v1535_v47 }
 0x192   : > { %v1438_v26 = vsel %vm369_vm0, %v1434_v63, %v1437_v33  ;;  %v1745_v58 = vpop.f32.mrf.mxu2 }
 0x193   : > { %v1666_v57 = vadd.f32 %v1665_v59, %v1635_v8  ;;  %2352 = vmatmul.msk.bf16.gmra.mxu1 %vm1049_vm4, %v1428_v31  ;;  %2396 = vmatmul.msk.bf16.gmra.mxu3 %vm1049_vm4, %v1438_v26  ;;  %v749_v6 = vpop.permute.xlu1 %748  ;;  %v1805_v16 = vadd.f32 %v1804_v30, %v1745_v58  ;;  %v1844_v37 = vmul.f32 %v1745_v58, %v1745_v58 }
 0x194   : > { %v1126_v41 = vpop.f32.mrf.mxu0  ;;  %v969_v21 = vsel %vm903_vm3, %v900_v19, %v749_v6 }
 0x195   : > { %v1184_v11 = vadd.f32 %v1183_v55, %v1126_v41  ;;  %v1223_v48 = vmul.f32 %v1126_v41, %v1126_v41  ;;  %v1875_v43 = vadd.f32 %v1874_v61, %v1844_v37 }
 0x196   : > { %v1962_v51 = vpop.f32.mrf.mxu3  ;;  %v831_v18 = vpop.permute.xlu0 %830 }
 0x197   : > { %v1254_v29 = vadd.f32 %v1253_v46, %v1223_v48  ;;  %v2023_v23 = vadd.f32 %v2022_v14, %v1962_v51  ;;  %v2062_v22 = vmul.f32 %v1962_v51, %v1962_v51  ;;  %v1038_v13 = vsel %vm972_vm2, %v969_v21, %v831_v18  ;;  %2331 = vmatmul.msk.bf16.gmra.mxu0 %vm1049_vm4, %v1034_v4 }
 0x198   : > { %v1903_v31 = vshll.u32 %v1038_v13, 16  ;;  %v1537_v10 = vpop.f32.mrf.mxu1  ;;  %2375 = vmatmul.msk.bf16.gmra.mxu2 %vm1049_vm4, %v1038_v13  ;;  %v1901_v45 = vshrl.u32 %v1038_v13, 16 }
 0x199   : > { %v2093_v3 = vadd.f32 %v2092_v1, %v2062_v22  ;;  %v1597_v25 = vadd.f32 %v1596_v5, %v1537_v10  ;;  %v1636_v20 = vmul.f32 %v1537_v10, %v1537_v10 }
 0x19a   : > { %v1748_v34 = vpop.f32.mrf.mxu2  ;;  %v1905_v28 = vrot.slane %v1903_v31, 1 }
 0x19b   : > { %v1667_v27 = vadd.f32 %v1666_v57, %v1636_v20  ;;  %v751_v32 = vpop.permute.xlu1 %750  ;;  %v1806_v40 = vadd.f32 %v1805_v16, %v1748_v34  ;;  %v1845_v4 = vmul.f32 %v1748_v34, %v1748_v34 }
 0x19c   : > { %v971_v12 = vsel %vm903_vm3, %v902_v2, %v751_v32  ;;  %v1128_v36 = vpop.f32.mrf.mxu0  ;;  %v1906_v52 = vor.u32 %v1905_v28, %v1901_v45 }
 0x19d   : > { %v1040_v0 = vsel %vm972_vm2, %v971_v12, %v833_v35  ;;  %v1185_v60 = vadd.f32 %v1184_v11, %v1128_v36  ;;  %v1224_v38 = vmul.f32 %v1128_v36, %v1128_v36  ;;  %v1876_v39 = vadd.f32 %v1875_v43, %v1845_v4 }
 0x19e   : > { %v1907_v59 = vshll.u32 %v1040_v0, 16  ;;  %v1964_v24 = vpop.f32.mrf.mxu3 }
 0x19f   : > { %v1255_v42 = vadd.f32 %v1254_v29, %v1224_v38  ;;  %v2024_v44 = vadd.f32 %v2023_v23, %v1964_v24  ;;  %v2063_v53 = vmul.f32 %v1964_v24, %v1964_v24 }
 0x1a0   : > { %v1909_v30 = vrot.slane %v1907_v59, 1  ;;  %v1540_v49 = vpop.f32.mrf.mxu1 }
 0x1a1   : > { %v2094_v17 = vadd.f32 %v2093_v3, %v2063_v53  ;;  %v1598_v55 = vadd.f32 %v1597_v25, %v1540_v49  ;;  %v1637_v56 = vmul.f32 %v1540_v49, %v1540_v49 }
 0x1a2   : > { %v1910_v50 = vsel %vm369_vm0, %v1906_v52, %v1909_v30  ;;  %v1750_v61 = vpop.f32.mrf.mxu2 }
 0x1a3   : > { %v1668_v62 = vadd.f32 %v1667_v27, %v1637_v56  ;;  %2353 = vmatmul.msk.bf16.gmra.mxu1 %vm1049_vm4, %v1438_v26  ;;  %2397 = vmatmul.msk.bf16.gmra.mxu3 %vm1049_vm4, %v1910_v50  ;;  %v1807_v15 = vadd.f32 %v1806_v40, %v1750_v61  ;;  %v1846_v46 = vmul.f32 %v1750_v61, %v1750_v61 }
 0x1a4   : > { %v1131_v7 = vpop.f32.mrf.mxu0 }
 0x1a5   : > { %v1186_v14 = vadd.f32 %v1185_v60, %v1131_v7  ;;  %v1225_v9 = vmul.f32 %v1131_v7, %v1131_v7  ;;  %v1877_v63 = vadd.f32 %v1876_v39, %v1846_v46 }
 0x1a6   : > { %v1967_v33 = vpop.f32.mrf.mxu3 }
 0x1a7   : > { %v1256_v47 = vadd.f32 %v1255_v42, %v1225_v9  ;;  %v2025_v54 = vadd.f32 %v2024_v44, %v1967_v33  ;;  %v2064_v1 = vmul.f32 %v1967_v33, %v1967_v33 }
 0x1a8   : > { %v1542_v5 = vpop.f32.mrf.mxu1 }
 0x1a9   : > { %v2095_v8 = vadd.f32 %v2094_v17, %v2064_v1  ;;  %v1599_v19 = vadd.f32 %v1598_v55, %v1542_v5  ;;  %v1638_v57 = vmul.f32 %v1542_v5, %v1542_v5 }
 0x1aa   : > { %v1753_v58 = vpop.f32.mrf.mxu2 }
 0x1ab   : > { %v1669_v6 = vadd.f32 %v1668_v62, %v1638_v57  ;;  %v1808_v41 = vadd.f32 %v1807_v15, %v1753_v58  ;;  %v1847_v16 = vmul.f32 %v1753_v58, %v1753_v58 }
 0x1ac   : > { %v1133_v26 = vpop.f32.mrf.mxu0 }
 0x1ad   : > { %v1187_v37 = vadd.f32 %v1186_v14, %v1133_v26  ;;  %v1226_v11 = vmul.f32 %v1133_v26, %v1133_v26  ;;  %v1878_v48 = vadd.f32 %v1877_v63, %v1847_v16 }
 0x1ae   : > { %v1969_v21 = vpop.f32.mrf.mxu3 }
 0x1af   : > { %v1257_v43 = vadd.f32 %v1256_v47, %v1226_v11  ;;  %v2026_v51 = vadd.f32 %v2025_v54, %v1969_v21  ;;  %v2065_v18 = vmul.f32 %v1969_v21, %v1969_v21 }
 0x1b0   : > { %v1545_v29 = vpop.f32.mrf.mxu1 }
 0x1b1   : > { %v2096_v23 = vadd.f32 %v2095_v8, %v2065_v18  ;;  %v1600_v22 = vadd.f32 %v1599_v19, %v1545_v29  ;;  %v1639_v13 = vmul.f32 %v1545_v29, %v1545_v29 }
 0x1b2   : > { %v1755_v10 = vpop.f32.mrf.mxu2 }
 0x1b3   : > { %v1670_v31 = vadd.f32 %v1669_v6, %v1639_v13  ;;  %v1809_v25 = vadd.f32 %v1808_v41, %v1755_v10  ;;  %v1848_v20 = vmul.f32 %v1755_v10, %v1755_v10 }
 0x1b4   : > { %v1136_v3 = vpop.f32.mrf.mxu0 }
 0x1b5   : > { %v1188_v35 = vadd.f32 %v1187_v37, %v1136_v3  ;;  %v1227_v2 = vmul.f32 %v1136_v3, %v1136_v3  ;;  %v1879_v27 = vadd.f32 %v1878_v48, %v1848_v20 }
 0x1b6   : > { %v1972_v32 = vpop.f32.mrf.mxu3 }
 0x1b7   : > { %v1258_v34 = vadd.f32 %v1257_v43, %v1227_v2  ;;  %v2027_v28 = vadd.f32 %v2026_v51, %v1972_v32  ;;  %v2066_v12 = vmul.f32 %v1972_v32, %v1972_v32 }
 0x1b8   : > { %v1547_v36 = vpop.f32.mrf.mxu1 }
 0x1b9   : > { %v2097_v40 = vadd.f32 %v2096_v23, %v2066_v12  ;;  %v1601_v4 = vadd.f32 %v1600_v22, %v1547_v36  ;;  %v1640_v0 = vmul.f32 %v1547_v36, %v1547_v36 }
 0x1bb   : > { %v1671_v60 = vadd.f32 %v1670_v31, %v1640_v0  ;;  %v1758_v38 = vpop.f32.mrf.mxu2 }
 0x1bc   : > { %v1138_v45 = vpop.f32.mrf.mxu0  ;;  %v1810_v59 = vadd.f32 %v1809_v25, %v1758_v38  ;;  %v1849_v39 = vmul.f32 %v1758_v38, %v1758_v38 }
 0x1bd   : > { %v1189_v24 = vadd.f32 %v1188_v35, %v1138_v45  ;;  %v1228_v42 = vmul.f32 %v1138_v45, %v1138_v45 }
 0x1be   : > { %v1880_v44 = vadd.f32 %v1879_v27, %v1849_v39  ;;  %v1974_v53 = vpop.f32.mrf.mxu3 }
 0x1bf   : > { %v1259_v52 = vadd.f32 %v1258_v34, %v1228_v42  ;;  %v2028_v30 = vadd.f32 %v2027_v28, %v1974_v53  ;;  %v2067_v49 = vmul.f32 %v1974_v53, %v1974_v53 }
 0x1c0   : > { %v1550_v17 = vpop.f32.mrf.mxu1 }
 0x1c1   : > { %v2098_v55 = vadd.f32 %v2097_v40, %v2067_v49  ;;  %v1602_v56 = vadd.f32 %v1601_v4, %v1550_v17  ;;  %v1641_v50 = vmul.f32 %v1550_v17, %v1550_v17 }
 0x1c3   : > { %v1672_v62 = vadd.f32 %v1671_v60, %v1641_v50  ;;  %v1760_v61 = vpop.f32.mrf.mxu2 }
 0x1c4   : > { %v1141_v7 = vpop.f32.mrf.mxu0  ;;  %v1811_v15 = vadd.f32 %v1810_v59, %v1760_v61  ;;  %v1850_v46 = vmul.f32 %v1760_v61, %v1760_v61 }
 0x1c5   : > { %v1190_v14 = vadd.f32 %v1189_v24, %v1141_v7  ;;  %v1229_v9 = vmul.f32 %v1141_v7, %v1141_v7 }
 0x1c6   : > { %v1881_v63 = vadd.f32 %v1880_v44, %v1850_v46  ;;  %v1977_v33 = vpop.f32.mrf.mxu3 }
 0x1c7   : > { %v1260_v47 = vadd.f32 %v1259_v52, %v1229_v9  ;;  %v2029_v54 = vadd.f32 %v2028_v30, %v1977_v33  ;;  %v2068_v1 = vmul.f32 %v1977_v33, %v1977_v33 }
 0x1c8   : > { %v1552_v5 = vpop.f32.mrf.mxu1 }
 0x1c9   : > { %v2099_v8 = vadd.f32 %v2098_v55, %v2068_v1  ;;  %v1603_v19 = vadd.f32 %v1602_v56, %v1552_v5  ;;  %v1642_v57 = vmul.f32 %v1552_v5, %v1552_v5 }
 0x1cb   : > { %v1673_v6 = vadd.f32 %v1672_v62, %v1642_v57  ;;  %v1763_v58 = vpop.f32.mrf.mxu2 }
 0x1cc   : > { %v1143_v26 = vpop.f32.mrf.mxu0  ;;  %v1812_v41 = vadd.f32 %v1811_v15, %v1763_v58  ;;  %v1851_v16 = vmul.f32 %v1763_v58, %v1763_v58 }
 0x1cd   : > { %v1230_v49 = vmul.f32 %v1143_v26, %v1143_v26  ;;  %v1191_v62 = vadd.f32 %v1190_v14, %v1143_v26 }
 0x1ce   : > { %v1882_v37 = vadd.f32 %v1881_v63, %v1851_v16  ;;  %v1979_v11 = vpop.f32.mrf.mxu3 }
 0x1cf   : > { %v2030_v48 = vadd.f32 %v2029_v54, %v1979_v11  ;;  %v2069_v21 = vmul.f32 %v1979_v11, %v1979_v11  ;;  %v1261_v7 = vadd.f32 %v1260_v47, %v1230_v49 }
 0x1d0   : > { %v1555_v43 = vpop.f32.mrf.mxu1 }
 0x1d1   : > { %v2100_v51 = vadd.f32 %v2099_v8, %v2069_v21  ;;  %v1604_v18 = vadd.f32 %v1603_v19, %v1555_v43  ;;  %v1643_v29 = vmul.f32 %v1555_v43, %v1555_v43 }
 0x1d3   : > { %v1674_v23 = vadd.f32 %v1673_v6, %v1643_v29  ;;  %v1765_v22 = vpop.f32.mrf.mxu2 }
 0x1d4   : > { %v1146_v13 = vpop.f32.mrf.mxu0  ;;  %v1852_v56 = vmul.f32 %v1765_v22, %v1765_v22  ;;  %v1813_v1 = vadd.f32 %v1812_v41, %v1765_v22 }
 0x1d5   : > { %v1231_v55 = vmul.f32 %v1146_v13, %v1146_v13  ;;  %v1192_v9 = vadd.f32 %v1191_v62, %v1146_v13 }
 0x1d6   : > { %v1982_v31 = vpop.f32.mrf.mxu3  ;;  %v1883_v5 = vadd.f32 %v1882_v37, %v1852_v56 }
 0x1d7   : > { %v2031_v10 = vadd.f32 %v2030_v48, %v1982_v31  ;;  %v2070_v3 = vmul.f32 %v1982_v31, %v1982_v31  ;;  %v1262_v54 = vadd.f32 %v1261_v7, %v1231_v55 }
 0x1d8   : > { %v1557_v25 = vpop.f32.mrf.mxu1 }
 0x1d9   : > { %v2101_v20 = vadd.f32 %v2100_v51, %v2070_v3  ;;  %v1644_v61 = vmul.f32 %v1557_v25, %v1557_v25  ;;  %v1605_v57 = vadd.f32 %v1604_v18, %v1557_v25 }
 0x1db   : > { %v1768_v35 = vpop.f32.mrf.mxu2  ;;  %v1675_v6 = vadd.f32 %v1674_v23, %v1644_v61 }
 0x1dc   : > { %v1148_v2 = vpop.f32.mrf.mxu0  ;;  %v1853_v46 = vmul.f32 %v1768_v35, %v1768_v35  ;;  %v1814_v48 = vadd.f32 %v1813_v1, %v1768_v35 }
 0x1dd   : > { %v1232_v15 = vmul.f32 %v1148_v2, %v1148_v2  ;;  %v1193_v58 = vadd.f32 %v1192_v9, %v1148_v2 }
 0x1de   : > { %v1984_v27 = vpop.f32.mrf.mxu3  ;;  %v1884_v14 = vadd.f32 %v1883_v5, %v1853_v46 }
 0x1df   : > { %v2071_v63 = vmul.f32 %v1984_v27, %v1984_v27  ;;  %v1263_v11 = vadd.f32 %v1262_v54, %v1232_v15  ;;  %v2032_v21 = vadd.f32 %v2031_v10, %v1984_v27 }
 0x1e0   : > { %v1560_v32 = vpop.f32.mrf.mxu1 }
 0x1e1   : > { %v1645_v8 = vmul.f32 %v1560_v32, %v1560_v32  ;;  %v2102_v43 = vadd.f32 %v2101_v20, %v2071_v63  ;;  %v1606_v13 = vadd.f32 %v1605_v57, %v1560_v32 }
 0x1e3   : > { %v1770_v34 = vpop.f32.mrf.mxu2  ;;  %v1676_v31 = vadd.f32 %v1675_v6, %v1645_v8 }
 0x1e4   : > { %v1151_v28 = vpop.f32.mrf.mxu0  ;;  %v1854_v16 = vmul.f32 %v1770_v34, %v1770_v34  ;;  %v1815_v18 = vadd.f32 %v1814_v48, %v1770_v34 }
 0x1e5   : > { %v1233_v26 = vmul.f32 %v1151_v28, %v1151_v28  ;;  %v1194_v51 = vadd.f32 %v1193_v58, %v1151_v28 }
 0x1e6   : > { %v1987_v12 = vpop.f32.mrf.mxu3  ;;  %v1885_v23 = vadd.f32 %v1884_v14, %v1854_v16 }
 0x1e7   : > { %v2072_v29 = vmul.f32 %v1987_v12, %v1987_v12  ;;  %v1264_v35 = vadd.f32 %v1263_v11, %v1233_v26  ;;  %v2033_v2 = vadd.f32 %v2032_v21, %v1987_v12 }
 0x1e8   : > { %v1562_v36 = vpop.f32.mrf.mxu1 }
 0x1e9   : > { %v1646_v41 = vmul.f32 %v1562_v36, %v1562_v36  ;;  %v2103_v27 = vadd.f32 %v2102_v43, %v2072_v29  ;;  %v1607_v28 = vadd.f32 %v1606_v13, %v1562_v36 }
 0x1eb   : > { %v3287_v40 = vpop.f32.mrf.mxu2  ;;  %v1677_v56 = vadd.f32 %v1676_v31, %v1646_v41 }
 0x1ec   : > { %v1153_v4 = vpop.f32.mrf.mxu0  ;;  %v1855_v25 = vmul.f32 %v3287_v40, %v3287_v40 }
 0x1ed   : > { %v1234_v37 = vmul.f32 %v1153_v4, %v1153_v4  ;;  %v1195_v3 = vadd.f32 %v1194_v51, %v1153_v4  ;;  %v1816_v4 = vadd.f32 %v1815_v18, %v3287_v40 }
 0x1ee   : > { %v3289_v0 = vpop.f32.mrf.mxu3  ;;  %v1886_v7 = vadd.f32 %v1885_v23, %v1855_v25 }
 0x1ef   : > { %v2073_v10 = vmul.f32 %v3289_v0, %v3289_v0  ;;  %v1265_v34 = vadd.f32 %v1264_v35, %v1234_v37  ;;  %v2034_v12 = vadd.f32 %v2033_v2, %v3289_v0 }
 0x1f0   : > { %v3291_v60 = vpop.f32.mrf.mxu1 }
 0x1f1   : > { %v1647_v32 = vmul.f32 %v3291_v60, %v3291_v60  ;;  %v2104_v9 = vadd.f32 %v2103_v27, %v2073_v10  ;;  %v1608_v40 = vadd.f32 %v1607_v28, %v3291_v60 }
 0x1f3   : > { %v3293_v38 = vpop.f32.mrf.mxu2  ;;  %v1678_v1 = vadd.f32 %v1677_v56, %v1647_v32 }
 0x1f4   : > { %v1156_v45 = vpop.f32.mrf.mxu0  ;;  %v1856_v15 = vmul.f32 %v3293_v38, %v3293_v38 }
 0x1f5   : > { %v1235_v20 = vmul.f32 %v1156_v45, %v1156_v45  ;;  %v1196_v49 = vadd.f32 %v1195_v3, %v1156_v45 }
 0x1f6   : > { %v3295_v59 = vpop.f32.mrf.mxu3  ;;  %v1887_v16 = vadd.f32 %v1886_v7, %v1856_v15 }
 0x1f7   : > { %v1266_v36 = vadd.f32 %v1265_v34, %v1235_v20  ;;  %v2074_v63 = vmul.f32 %v3295_v59, %v3295_v59  ;;  %v2035_v11 = vadd.f32 %v2034_v12, %v3295_v59 }
 0x1f8   : > { %v3297_v39 = vpop.f32.mrf.mxu1 }
 0x1f9   : > { %v1648_v8 = vmul.f32 %v3297_v39, %v3297_v39  ;;  %v2105_v14 = vadd.f32 %v2104_v9, %v2074_v63 }
 0x1fb   : > { %v3299_v24 = vpop.f32.mrf.mxu2  ;;  %v1679_v31 = vadd.f32 %v1678_v1, %v1648_v8 }
 0x1fc   : > { %v1158_v42 = vpop.f32.mrf.mxu0  ;;  %v1857_v0 = vmul.f32 %v3299_v24, %v3299_v24 }
 0x1fd   : > { %v1236_v62 = vmul.f32 %v1158_v42, %v1158_v42  ;;  %v1197_v46 = vadd.f32 %v1196_v49, %v1158_v42  ;;  %v1817_v42 = vadd.f32 %v1816_v4, %v3293_v38  ;;  %v1609_v38 = vadd.f32 %v1608_v40, %v3297_v39 }
 0x1fe   : > { %v3301_v44 = vpop.f32.mrf.mxu3  ;;  %v1888_v43 = vadd.f32 %v1887_v16, %v1857_v0 }
 0x1ff   : > { %v1267_v57 = vadd.f32 %v1266_v36, %v1236_v62  ;;  %v1818_v26 = vadd.f32 %v1817_v42, %v3299_v24  ;;  %v2075_v51 = vmul.f32 %v3301_v44, %v3301_v44 }
 0x200   : > { %v3303_v53 = vpop.f32.mrf.mxu1 }
 0x201   : > { %v1649_v24 = vmul.f32 %v3303_v53, %v3303_v53  ;;  %v2106_v20 = vadd.f32 %v2105_v14, %v2075_v51  ;;  %v1610_v27 = vadd.f32 %v1609_v38, %v3303_v53 }
 0x203   : > { %v3305_v52 = vpop.f32.mrf.mxu2  ;;  %v1680_v62 = vadd.f32 %v1679_v31, %v1649_v24 }
 0x204   : > { %v3307_v30 = vpop.f32.mrf.mxu0  ;;  %v1858_v60 = vmul.f32 %v3305_v52, %v3305_v52  ;;  %v1819_v59 = vadd.f32 %v1818_v26, %v3305_v52  ;;  %v2036_v52 = vadd.f32 %v2035_v11, %v3301_v44 }
 0x205   : > { %v1237_v45 = vmul.f32 %v3307_v30, %v3307_v30  ;;  %v1198_v5 = vadd.f32 %v1197_v46, %v3307_v30 }
 0x206   : > { %v3309_v17 = vpop.f32.mrf.mxu3  ;;  %v1889_v18 = vadd.f32 %v1888_v43, %v1858_v60 }
 0x207   : > { %v1268_v21 = vadd.f32 %v1267_v57, %v1237_v45  ;;  %v2076_v3 = vmul.f32 %v3309_v17, %v3309_v17  ;;  %v2037_v44 = vadd.f32 %v2036_v52, %v3309_v17 }
 0x208   : > { %v3311_v50 = vpop.f32.mrf.mxu1 }
 0x209   : > { %v1650_v28 = vmul.f32 %v3311_v50, %v3311_v50  ;;  %v2107_v12 = vadd.f32 %v2106_v20, %v2076_v3 }
 0x20b   : > { %v3313_v33 = vpop.f32.mrf.mxu2  ;;  %v1681_v46 = vadd.f32 %v1680_v62, %v1650_v28 }
 0x20c   : > { %v1163_v19 = vpop.f32.mrf.mxu0  ;;  %v1820_v25 = vadd.f32 %v1819_v59, %v3313_v33 }
 0x20d   : > { %v1238_v6 = vmul.f32 %v1163_v19, %v1163_v19  ;;  %v1199_v48 = vadd.f32 %v1198_v5, %v1163_v19  ;;  %v1859_v19 = vmul.f32 %v3313_v33, %v3313_v33 }
 0x20e   : > { %v3315_v47 = vpop.f32.mrf.mxu3 }
 0x20f   : > { %v1269_v41 = vadd.f32 %v1268_v21, %v1238_v6  ;;  %v1890_v32 = vadd.f32 %v1889_v18, %v1859_v19  ;;  %v2077_v9 = vmul.f32 %v3315_v47, %v3315_v47  ;;  %v2038_v11 = vadd.f32 %v2037_v44, %v3315_v47 }
 0x210   : > { %v3317_v22 = vpop.f32.mrf.mxu1 }
 0x211   : > { %v1651_v33 = vmul.f32 %v3317_v22, %v3317_v22  ;;  %v2108_v60 = vadd.f32 %v2107_v12, %v2077_v9 }
 0x213   : > { %v1785_v55 = vpop.f32.mrf.mxu2  ;;  %v1682_v0 = vadd.f32 %v1681_v46, %v1651_v33 }
 0x214   : > { %v1166_v61 = vpop.f32.mrf.mxu0  ;;  %v1860_v2 = vmul.f32 %v1785_v55, %v1785_v55  ;;  %v1821_v49 = vadd.f32 %v1820_v25, %v1785_v55 }
 0x215   : > { %v1239_v30 = vmul.f32 %v1166_v61, %v1166_v61  ;;  %v1200_v29 = vadd.f32 %v1199_v48, %v1166_v61  ;;  %v1611_v61 = vadd.f32 %v1610_v27, %v3311_v50 }
 0x216   : > { %v3333_v54 = vpop.f32.mrf.mxu3  ;;  %v1891_v15 = vadd.f32 %v1890_v32, %v1860_v2 }
 0x217   : > { %v1270_v35 = vadd.f32 %v1269_v41, %v1239_v30  ;;  %v1612_v55 = vadd.f32 %v1611_v61, %v3317_v22  ;;  %v2078_v5 = vmul.f32 %v3333_v54, %v3333_v54  ;;  %v2039_v43 = vadd.f32 %v2038_v11, %v3333_v54 }
 0x218   : > { %v1577_v58 = vpop.f32.mrf.mxu1 }
 0x219   : > { %v1652_v36 = vmul.f32 %v1577_v58, %v1577_v58  ;;  %v1613_v17 = vadd.f32 %v1612_v55, %v1577_v58  ;;  %v2109_v51 = vadd.f32 %v2108_v60, %v2078_v5 }
 0x21b   : > { %v1788_v13 = vpop.f32.mrf.mxu2  ;;  %v1683_v22 = vadd.f32 %v1682_v0, %v1652_v36 }
 0x21c   : > { %v1168_v37 = vpop.f32.mrf.mxu0  ;;  %v1861_v34 = vmul.f32 %v1788_v13, %v1788_v13  ;;  %v1822_v53 = vadd.f32 %v1821_v49, %v1788_v13 }
 0x21d   : > { %v1201_v23 = vadd.f32 %v1200_v29, %v1168_v37  ;;  %v1240_v39 = vmul.f32 %v1168_v37, %v1168_v37 }
 0x21e   : > { %v2004_v10 = vpop.f32.mrf.mxu3  ;;  %v1892_v40 = vadd.f32 %v1891_v15, %v1861_v34 }
 0x21f   : > { %v1271_v56 = vadd.f32 %v1270_v35, %v1240_v39  ;;  %v1202_v7 = vrot.slane %v1201_v23, 4  ;;  %v2079_v26 = vmul.f32 %v2004_v10, %v2004_v10  ;;  %v2040_v19 = vadd.f32 %v2039_v43, %v2004_v10 }
 0x220   : > { %v1580_v4 = vpop.f32.mrf.mxu1 }
 0x221   : > { %v1272_v45 = vrot.slane %v1271_v56, 4  ;;  %v1203_v42 = vadd.f32 %v1202_v7, %v1201_v23  ;;  %v1653_v8 = vmul.f32 %v1580_v4, %v1580_v4  ;;  %v1614_v48 = vadd.f32 %v1613_v17, %v1580_v4 }
 0x222   : > { %v2110_v18 = vadd.f32 %v2109_v51, %v2079_v26 }
 0x223   : > { %v1790_v63 = vpop.f32.mrf.mxu2  ;;  %v1273_v14 = vadd.f32 %v1272_v45, %v1271_v56  ;;  %v1204_v29 = vrot.slane %v1203_v42, 2  ;;  %v1684_v13 = vadd.f32 %v1683_v22, %v1653_v8 }
 0x224   : > { %v1823_v50 = vadd.f32 %v1822_v53, %v1790_v63  ;;  %v1862_v1 = vmul.f32 %v1790_v63, %v1790_v63 }
 0x225   : > { %v1274_v24 = vrot.slane %v1273_v14, 2  ;;  %v1205_v39 = vadd.f32 %v1204_v29, %v1203_v42 }
 0x226   : > { %v1824_v57 = vrot.slane %v1823_v50, 4  ;;  %v1893_v6 = vadd.f32 %v1892_v40, %v1862_v1  ;;  %v2007_v16 = vpop.f32.mrf.mxu3 }
 0x227   : > { %v2080_v59 = vmul.f32 %v2007_v16, %v2007_v16  ;;  %v2041_v3 = vadd.f32 %v2040_v19, %v2007_v16  ;;  %v1275_v49 = vadd.f32 %v1274_v24, %v1273_v14  ;;  %v1206_v10 = vrot.slane %v1205_v39, 1 }
 0x228   : > { %v1825_v21 = vadd.f32 %v1824_v57, %v1823_v50  ;;  %v1894_v30 = vrot.slane %v1893_v6, 4  ;;  %v1582_v38 = vpop.f32.mrf.mxu1 }
 0x229   : > { %v1615_v58 = vadd.f32 %v1614_v48, %v1582_v38  ;;  %v1654_v41 = vmul.f32 %v1582_v38, %v1582_v38  ;;  %v2111_v2 = vadd.f32 %v2110_v18, %v2080_v59  ;;  %v1276_v53 = vrot.slane %v1275_v49, 1 }
 0x22a   : > { %v1895_v31 = vadd.f32 %v1894_v30, %v1893_v6  ;;  %v1826_v37 = vrot.slane %v1825_v21, 2  ;;  %v1207_v9 = vadd.f32 %v1206_v10, %v1205_v39 }
 0x22b   : > { %v1616_v47 = vrot.slane %v1615_v58, 4  ;;  %v1685_v23 = vadd.f32 %v1684_v13, %v1654_v41  ;;  %v1277_v17 = vadd.f32 %v1276_v53, %v1275_v49 }
 0x22c   : > { %v1896_v35 = vrot.slane %v1895_v31, 2  ;;  %v1827_v20 = vadd.f32 %v1826_v37, %v1825_v21 }
 0x22d   : > { %v1617_v25 = vadd.f32 %v1616_v47, %v1615_v58  ;;  %v1686_v52 = vrot.slane %v1685_v23, 4 }
 0x22e   : > { %v2009_v54 = vpop.f32.mrf.mxu3  ;;  %v1897_v61 = vadd.f32 %v1896_v35, %v1895_v31  ;;  %v1828_v7 = vrot.slane %v1827_v20, 1 }
 0x22f   : > { %v1618_v27 = vrot.slane %v1617_v25, 2  ;;  %v2042_v28 = vadd.f32 %v2041_v3, %v2009_v54  ;;  %v2081_v32 = vmul.f32 %v2009_v54, %v2009_v54  ;;  %v1687_v56 = vadd.f32 %v1686_v52, %v1685_v23 }
 0x230   : > { %v1898_v45 = vrot.slane %v1897_v61, 1  ;;  %v1829_v50 = vadd.f32 %v1828_v7, %v1827_v20 }
 0x231   : > { %v1619_v34 = vadd.f32 %v1618_v27, %v1617_v25  ;;  %v2043_v4 = vrot.slane %v2042_v28, 4  ;;  %v2112_v62 = vadd.f32 %v2111_v2, %v2081_v32  ;;  %v1688_v33 = vrot.slane %v1687_v56, 2 }
 0x232   : > { %v1899_v16 = vadd.f32 %v1898_v45, %v1897_v61 }
 0x233   : > { %v1620_v44 = vrot.slane %v1619_v34, 1  ;;  %v2044_v12 = vadd.f32 %v2043_v4, %v2042_v28  ;;  %v2113_v15 = vrot.slane %v2112_v62, 4  ;;  %v1689_v46 = vadd.f32 %v1688_v33, %v1687_v56 }
 0x235   : > { %v1621_v55 = vadd.f32 %v1620_v44, %v1619_v34  ;;  %v2045_v36 = vrot.slane %v2044_v12, 2  ;;  %v2114_v63 = vadd.f32 %v2113_v15, %v2112_v62  ;;  %v1690_v40 = vrot.slane %v1689_v46, 1 }
 0x237   : > { %v1622_v1 = vadd.f32 %v1621_v55, %v1207_v9  ;;  %v2046_v0 = vadd.f32 %v2045_v36, %v2044_v12  ;;  %v2115_v5 = vrot.slane %v2114_v63, 2  ;;  %v1691_v42 = vadd.f32 %v1690_v40, %v1689_v46 }
 0x239   : > { %v2047_v8 = vrot.slane %v2046_v0, 1  ;;  %v2116_v57 = vadd.f32 %v2115_v5, %v2114_v63  ;;  %v1830_v6 = vadd.f32 %v1829_v50, %v1622_v1  ;;  %v1692_v11 = vadd.f32 %v1691_v42, %v1277_v17 }
 0x23b   : > { %v2048_v60 = vadd.f32 %v2047_v8, %v2046_v0  ;;  %v2117_v22 = vrot.slane %v2116_v57, 1  ;;  %v1900_v48 = vadd.f32 %v1899_v16, %v1692_v11 }
 0x23d   : > { %v2049_v14 = vadd.f32 %v2048_v60, %v1830_v6  ;;  %v2118_v26 = vadd.f32 %v2117_v22, %v2116_v57 }
 0x23f   : > { %2120 = vst [vmem:[%s166_s29] sm:$0x1] %v2049_v14  ;;  %v2119_v21 = vadd.f32 %v2118_v26, %v1900_v48 }
 0x240   : > { %2497 = shalt.err (!%p2494_p3)
}
 0x241   : > { %2423 = dma.vmem_to_hbm [thread:$0]  (%p2627_p5), %s2138_s30, 16, %s2140_s4, %s2123_s16   ;;  %2121 = vst [vmem:[%s172_s5] sm:$0x1] %v2119_v21 }
 0x242   : > { %s2127_s25 = scalar_lea.sflag [#allocation5], %s3373_s19  ;;  %s2512_s26 = sshra.s32 %s2153_s7, 4  ;;  %s2513_s26 = int_to_ptr.hbm [resolvable:$true] %s2512_s26 }
 0x243   : > { %s2514_s27 = scalar_lea.hbm %s2513_s26, 1  ;;  %s2518_s8 = scalar_lea.hbm %s3445_s3, 2 }
 0x244   : > { %p2515_p4 = scmp.ne.s32.totalorder %s2513_s26, %s2514_s27  ;;  %p2519_p9 = scmp.lt.s32.totalorder %s2513_s26, %s3445_s3 }
 0x245   : > { %p2520_p10 = scmp.lt.s32.totalorder %s2518_s8, %s2514_s27 }
 0x246   : > { %p2516_p7 = pnand %p2515_p4, %p2627_p5 }
 0x247   : > { %p2521_p11 = por %p2520_p10, %p2519_p9 }
 0x248   : > { %p2517_p8 = pneg %p2516_p7 }
 0x24a   : > { %p2522_p12 = pnand %p2521_p11, %p2517_p8 }
 0x24c   : > { %2525 = shalt.err (!%p2522_p12)
}
 0x24d   : > { %2424 = dma.vmem_to_hbm [thread:$0]  (%p2627_p5), %s2151_s6, 16, %s2153_s7, %s2127_s25  }
 0x24e PF: > { %p2434_p13 = scmp.ge.s32.totalorder %s2564_s15, 2  ;;  %s2164_s19 = sand.u32 1, %s2552_s12  }
 0x24f   : > { %s2165_s30 = scalar_lea.sflag [#allocation3], %s2164_s19 }
 0x250   : > { %p2428_p0 = pnand %p2434_p13, %p2631_p6 }
 0x252   : > { %p2429_p1 = pneg %p2428_p0 }
 0x254   : > { %2543 = dma.done.wait (%p2429_p1), %s2165_s30, 16  }
 0x255   : > { %2545 = vsyncadd (%p2429_p1), %s2165_s30, 4294967280  ;;  %s2174_s4 = scalar_lea.sflag [#allocation5], %s2164_s19 }
 0x256   : > { %2547 = dma.done.wait (%p2429_p1), %s2174_s4, 16  }
 0x257   : > { %2549 = vsyncadd (%p2429_p1), %s2174_s4, 4294967280  ;;  %p17_p5 = scmp.ge.s32.totalorder %s2614_s18, 4   ;;  %s3448_s12 = smov %s2556_s13 }
 0x258   : > { %s3449_s13 = smov %s2560_s14  ;;  %s3450_s14 = smov %s2625_s21 }
 0x259   : > { %s3451_s15 = smov %s2614_s18  ;;  %19 = sbr.rel (!%p17_p5) target bundleno = 5 (0x5), region = 83 }
 0x25e   :  { %2179 = vsyncpa [#allocation3], 1 }
 0x25f   :  { %2181 = vsyncpa [#allocation3 + $0x1], 1 }
 0x260   :  { %2182 = vsyncpa [#allocation5], 1 }
 0x261   :  { %2184 = vsyncpa [#allocation5 + $0x1], 1 }

</bundles_post_ra>
